<compile_context>
chip_gen: v6e
topology: v6e:2x2x1
jax: 0.10.0
libtpu: 0.0.40
codegen_flags: <defaults>
</compile_context>

<pallas_src>
import jax
import jax.numpy as jnp
from jax import lax
from jax.experimental import pallas as pl
from jax.experimental.pallas import tpu as pltpu

B = 2          # batch
CIN = 4        # dim
COUT = 8       # dim_out
H = 16         # spatial height
W_SP = 16      # spatial width
HW = H * W_SP
BHW = B * HW
GROUPS = 8     # GroupNorm groups (== COUT -> group size 1 channel)
TEMB = 32      # time_emb_dim
EPS = 1e-5     # PyTorch GroupNorm default eps

# --- packed weight-slab column offsets (all matmul segments 128-lane aligned) ---
_W1_OFF = 0                       # (COUT, 9*CIN)  cols  0:36
_WRES_OFF = _W1_OFF + 9 * CIN     # (COUT, CIN)    cols 36:40
_VEC_OFF = _WRES_OFF + CIN        # 7 per-channel vectors, cols 40:47
_W2_OFF = 128                     # (COUT, 9*COUT) cols 128:200
_WSLAB_COLS = 256                 # padded to two lane-tiles


def _silu(v):
    return v * jax.nn.sigmoid(v)


def resnet_block_kernel(x_ref, temb_ref, w_ref, t_ref, m_ref, o_ref, col_ref):
    # ---- unpack packed slabs with static (free) slices ----
    w1 = w_ref[:, _W1_OFF:_W1_OFF + 9 * CIN]        # (COUT, 36)
    wres = w_ref[:, _WRES_OFF:_WRES_OFF + CIN]      # (COUT, 4)
    b1 = w_ref[:, _VEC_OFF + 0:_VEC_OFF + 1]        # (COUT, 1)
    g1 = w_ref[:, _VEC_OFF + 1:_VEC_OFF + 2]
    be1 = w_ref[:, _VEC_OFF + 2:_VEC_OFF + 3]
    b2 = w_ref[:, _VEC_OFF + 3:_VEC_OFF + 4]
    g2 = w_ref[:, _VEC_OFF + 4:_VEC_OFF + 5]
    be2 = w_ref[:, _VEC_OFF + 5:_VEC_OFF + 6]
    bres = w_ref[:, _VEC_OFF + 6:_VEC_OFF + 7]
    w2 = w_ref[:, _W2_OFF:_W2_OFF + 9 * COUT]       # (COUT, 72)

    wlin = t_ref[:, 0:TEMB]                         # (2*COUT, TEMB)
    blin = t_ref[:, TEMB:TEMB + 1]                  # (2*COUT, 1)

    # ---- fold batch into lanes: x as (CIN, B*HW) ----
    x = jnp.concatenate([x_ref[b] for b in range(B)], axis=1)

    # ---- time-embedding MLP: SiLU -> Linear, per-batch (scale; shift) columns ----
    ss = jnp.dot(wlin, _silu(temb_ref[...]),
                 preferred_element_type=jnp.float32) + blin   # (2*COUT, B)
    scale = ss[:COUT, :]                                       # (COUT, B)
    shift = ss[COUT:, :]

    def im2col(src, cin):
        # rows k*cin:(k+1)*cin of col_ref hold tap k of src (masked lane-rolls).
        # Rolls wrap across batch blocks only at positions the mask zeroes.
        for k in range(9):
            dy, dx = k // 3 - 1, k % 3 - 1
            s = dy * W_SP + dx
            shifted = src if s == 0 else pltpu.roll(src, (-s) % BHW, axis=1)
            col_ref[k * cin:(k + 1) * cin, :] = shifted * m_ref[k:k + 1, :]

    def group_norm(h, gamma, beta, post):
        # channels == groups, so stats are per channel per SAMPLE: compute on
        # each 256-lane batch block separately (static, 128-aligned slices).
        parts = []
        for b in range(B):
            hb = h[:, b * HW:(b + 1) * HW]
            mean = jnp.mean(hb, axis=1, keepdims=True)
            d = hb - mean
            var = jnp.mean(d * d, axis=1, keepdims=True)
            hb = d * lax.rsqrt(var + EPS) * gamma + beta
            parts.append(post(hb, b))
        return jnp.concatenate(parts, axis=1)

    # ---- block1: 3x3 conv (one matmul) -> GN -> scale/shift -> SiLU ----
    im2col(x, CIN)
    h = jnp.dot(w1, col_ref[0:9 * CIN, :],
                preferred_element_type=jnp.float32) + b1
    h = group_norm(
        h, g1, be1,
        lambda hb, b: _silu(hb * (scale[:, b:b + 1] + 1.0) + shift[:, b:b + 1]))

    # ---- block2: 3x3 conv (one matmul) -> GN -> SiLU ----
    im2col(h, COUT)
    h2 = jnp.dot(w2, col_ref[...],
                 preferred_element_type=jnp.float32) + b2
    h2 = group_norm(h2, g2, be2, lambda hb, b: _silu(hb))

    # ---- residual 1x1 conv + output (lane-dense per-batch stores) ----
    res = jnp.dot(wres, x, preferred_element_type=jnp.float32) + bres
    y = h2 + res
    for b in range(B):
        o_ref[b] = y[:, b * HW:(b + 1) * HW].astype(o_ref.dtype)


def resnet_block_forward(x_nchw, temb, p):
    Bn, Ci, Hh, Ww = x_nchw.shape
    assert (Bn, Ci, Hh, Ww) == (B, CIN, H, W_SP), "shape/constant mismatch"
    assert temb.shape == (B, TEMB)

    # --- tiny wrapper-side repacks (no im2col, no big HLOs) ---
    x3 = x_nchw.reshape(B, CIN, HW)                 # free reshape, NCHW order
    temb_t = temb.T                                  # (TEMB, B)

    # conv weights as (COUT, 9*Cin) matmul matrices (tap-major columns)
    w1_mat = jnp.transpose(p["w1"], (0, 2, 3, 1)).reshape(COUT, 9 * CIN)
    w2_mat = jnp.transpose(p["w2"], (0, 2, 3, 1)).reshape(COUT, 9 * COUT)

    # packed weight slab (8, 256)
    wslab = jnp.zeros((COUT, _WSLAB_COLS), jnp.float32)
    wslab = wslab.at[:, _W1_OFF:_W1_OFF + 9 * CIN].set(w1_mat)
    wslab = wslab.at[:, _WRES_OFF:_WRES_OFF + CIN].set(p["wres"])
    for j, name in enumerate(["b1", "gn1_g", "gn1_b", "b2", "gn2_g", "gn2_b", "bres"]):
        wslab = wslab.at[:, _VEC_OFF + j].set(p[name])
    wslab = wslab.at[:, _W2_OFF:_W2_OFF + 9 * COUT].set(w2_mat)

    # time-MLP slab (16, 33): wlin | blin
    tslab = jnp.concatenate([p["wlin"], p["blin"][:, None]], axis=1)

    # boundary masks for the in-kernel im2col, tiled over the batch blocks
    r = jnp.arange(HW) // W_SP
    c = jnp.arange(HW) % W_SP
    mask9 = jnp.stack([((r + (k // 3 - 1) >= 0) & (r + (k // 3 - 1) < H) &
                        (c + (k % 3 - 1) >= 0) & (c + (k % 3 - 1) < W_SP))
                       for k in range(9)]).astype(jnp.float32)     # (9, HW)
    mslab = jnp.tile(mask9, (1, B))                                 # (9, B*HW)

    args = (x3, temb_t, wslab, tslab, mslab)

    def full_spec(a):
        nd = a.ndim
        return pl.BlockSpec(a.shape, lambda i, _nd=nd: (0,) * _nd)

    out = pl.pallas_call(
        resnet_block_kernel,
        out_shape=jax.ShapeDtypeStruct((B, COUT, HW), jnp.float32),
        grid=(1,),
        in_specs=[full_spec(a) for a in args],
        out_specs=pl.BlockSpec((B, COUT, HW), lambda i: (0, 0, 0)),
        scratch_shapes=[pltpu.VMEM((9 * COUT, BHW), jnp.float32)],
        compiler_params=pltpu.CompilerParams(
            dimension_semantics=("arbitrary",)),
    )(*args)

    # (B, C, HW) kernel layout -> NCHW with a free reshape
    return out.reshape(B, COUT, H, W_SP)


def reference_forward(x, temb, p):
    # pure-JAX reference mirroring the PyTorch ResnetBlock
    def conv2d(h, w, b, pad):
        out = lax.conv_general_dilated(
            h, w, (1, 1), ((pad, pad), (pad, pad)),
            dimension_numbers=("NCHW", "OIHW", "NCHW"))
        return out + b[None, :, None, None]

    def group_norm(h, gamma, beta):
        Bn, C, Hh, Ww = h.shape
        hr = h.reshape(Bn, GROUPS, -1)
        mean = hr.mean(-1, keepdims=True)
        var = hr.var(-1, keepdims=True)
        hn = ((hr - mean) / jnp.sqrt(var + EPS)).reshape(Bn, C, Hh, Ww)
        return hn * gamma[None, :, None, None] + beta[None, :, None, None]

    t = jax.nn.silu(temb) @ p["wlin"].T + p["blin"]
    scale, shift = t[:, :COUT], t[:, COUT:]
    h = conv2d(x, p["w1"], p["b1"], 1)
    h = group_norm(h, p["gn1_g"], p["gn1_b"])
    h = h * (scale[:, :, None, None] + 1.0) + shift[:, :, None, None]
    h = jax.nn.silu(h)
    h = conv2d(h, p["w2"], p["b2"], 1)
    h = group_norm(h, p["gn2_g"], p["gn2_b"])
    h = jax.nn.silu(h)
    res = conv2d(x, p["wres"][:, :, None, None], p["bres"], 0)
    return h + res


if __name__ == "__main__":
    keys = jax.random.split(jax.random.PRNGKey(0), 14)
    p = {
        "w1": 0.1 * jax.random.normal(keys[0], (COUT, CIN, 3, 3), jnp.float32),
        "b1": 0.1 * jax.random.normal(keys[1], (COUT,), jnp.float32),
        "gn1_g": 1.0 + 0.1 * jax.random.normal(keys[2], (COUT,), jnp.float32),
        "gn1_b": 0.1 * jax.random.normal(keys[3], (COUT,), jnp.float32),
        "wlin": 0.1 * jax.random.normal(keys[4], (2 * COUT, TEMB), jnp.float32),
        "blin": 0.1 * jax.random.normal(keys[5], (2 * COUT,), jnp.float32),
        "w2": 0.1 * jax.random.normal(keys[6], (COUT, COUT, 3, 3), jnp.float32),
        "b2": 0.1 * jax.random.normal(keys[7], (COUT,), jnp.float32),
        "gn2_g": 1.0 + 0.1 * jax.random.normal(keys[8], (COUT,), jnp.float32),
        "gn2_b": 0.1 * jax.random.normal(keys[9], (COUT,), jnp.float32),
        "wres": 0.1 * jax.random.normal(keys[10], (COUT, CIN), jnp.float32),
        "bres": 0.1 * jax.random.normal(keys[11], (COUT,), jnp.float32),
    }
    x = jax.random.normal(keys[12], (B, CIN, H, W_SP), jnp.float32)
    temb = jax.random.normal(keys[13], (B, TEMB), jnp.float32)

    out = jax.block_until_ready(resnet_block_forward(x, temb, p))
    assert out.shape == (B, COUT, H, W_SP)

    ref = reference_forward(x, temb, p)
    if not jnp.allclose(out, ref, atol=2e-4, rtol=2e-4):
        raise AssertionError("Pallas output does not match JAX reference")
    print("KERNEL_OK")
</pallas_src>

<mosaic_0001>
module attributes {stable_mosaic.version = 11 : i64} {
  func.func @resnet_block_kernel(%arg0: i32, %arg1: memref<2x4x256xf32, #tpu.memory_space<vmem>>, %arg2: memref<32x2xf32, #tpu.memory_space<vmem>>, %arg3: memref<8x256xf32, #tpu.memory_space<vmem>>, %arg4: memref<16x33xf32, #tpu.memory_space<vmem>>, %arg5: memref<9x512xf32, #tpu.memory_space<vmem>>, %arg6: memref<2x8x256xf32, #tpu.memory_space<vmem>>, %arg7: memref<72x512xf32, #tpu.memory_space<vmem>>) attributes {dimension_semantics = [#tpu.dimension_semantics<arbitrary>], iteration_bounds = array<i64: 1>, scalar_prefetch = 0 : i64, scratch_operands = 1 : i64, tpu.core_type = #tpu.core_type<tc>, window_params = [{pipeline_mode = #tpu.pipeline_mode<synchronous>, transform_indices = @transform_0, window_bounds = array<i64: 2, 4, 256>}, {pipeline_mode = #tpu.pipeline_mode<synchronous>, transform_indices = @transform_1, window_bounds = array<i64: 32, 2>}, {pipeline_mode = #tpu.pipeline_mode<synchronous>, transform_indices = @transform_2, window_bounds = array<i64: 8, 256>}, {pipeline_mode = #tpu.pipeline_mode<synchronous>, transform_indices = @transform_3, window_bounds = array<i64: 16, 33>}, {pipeline_mode = #tpu.pipeline_mode<synchronous>, transform_indices = @transform_4, window_bounds = array<i64: 9, 512>}, {pipeline_mode = #tpu.pipeline_mode<synchronous>, transform_indices = @transform_5, window_bounds = array<i64: 2, 8, 256>}]} {
    %c0 = arith.constant 0 : index
    %c0_0 = arith.constant 0 : index
    %0 = vector.load %arg3[%c0, %c0_0] : memref<8x256xf32, #tpu.memory_space<vmem>>, vector<8x36xf32>
    %c0_1 = arith.constant 0 : index
    %c36 = arith.constant 36 : index
    %1 = vector.load %arg3[%c0_1, %c36] : memref<8x256xf32, #tpu.memory_space<vmem>>, vector<8x4xf32>
    %c0_2 = arith.constant 0 : index
    %c40 = arith.constant 40 : index
    %2 = vector.load %arg3[%c0_2, %c40] : memref<8x256xf32, #tpu.memory_space<vmem>>, vector<8x1xf32>
    %c0_3 = arith.constant 0 : index
    %c41 = arith.constant 41 : index
    %3 = vector.load %arg3[%c0_3, %c41] : memref<8x256xf32, #tpu.memory_space<vmem>>, vector<8x1xf32>
    %c0_4 = arith.constant 0 : index
    %c42 = arith.constant 42 : index
    %4 = vector.load %arg3[%c0_4, %c42] : memref<8x256xf32, #tpu.memory_space<vmem>>, vector<8x1xf32>
    %c0_5 = arith.constant 0 : index
    %c43 = arith.constant 43 : index
    %5 = vector.load %arg3[%c0_5, %c43] : memref<8x256xf32, #tpu.memory_space<vmem>>, vector<8x1xf32>
    %c0_6 = arith.constant 0 : index
    %c44 = arith.constant 44 : index
    %6 = vector.load %arg3[%c0_6, %c44] : memref<8x256xf32, #tpu.memory_space<vmem>>, vector<8x1xf32>
    %c0_7 = arith.constant 0 : index
    %c45 = arith.constant 45 : index
    %7 = vector.load %arg3[%c0_7, %c45] : memref<8x256xf32, #tpu.memory_space<vmem>>, vector<8x1xf32>
    %c0_8 = arith.constant 0 : index
    %c46 = arith.constant 46 : index
    %8 = vector.load %arg3[%c0_8, %c46] : memref<8x256xf32, #tpu.memory_space<vmem>>, vector<8x1xf32>
    %c0_9 = arith.constant 0 : index
    %c128 = arith.constant 128 : index
    %9 = vector.load %arg3[%c0_9, %c128] : memref<8x256xf32, #tpu.memory_space<vmem>>, vector<8x72xf32>
    %c0_10 = arith.constant 0 : index
    %c0_11 = arith.constant 0 : index
    %10 = vector.load %arg4[%c0_10, %c0_11] : memref<16x33xf32, #tpu.memory_space<vmem>>, vector<16x32xf32>
    %c0_12 = arith.constant 0 : index
    %c32 = arith.constant 32 : index
    %11 = vector.load %arg4[%c0_12, %c32] : memref<16x33xf32, #tpu.memory_space<vmem>>, vector<16x1xf32>
    %c0_13 = arith.constant 0 : index
    %c0_14 = arith.constant 0 : index
    %c0_15 = arith.constant 0 : index
    %12 = vector.load %arg1[%c0_13, %c0_14, %c0_15] : memref<2x4x256xf32, #tpu.memory_space<vmem>>, vector<1x4x256xf32>
    %13 = vector.shape_cast %12 : vector<1x4x256xf32> to vector<4x256xf32>
    %c1 = arith.constant 1 : index
    %c0_16 = arith.constant 0 : index
    %c0_17 = arith.constant 0 : index
    %14 = vector.load %arg1[%c1, %c0_16, %c0_17] : memref<2x4x256xf32, #tpu.memory_space<vmem>>, vector<1x4x256xf32>
    %15 = vector.shape_cast %14 : vector<1x4x256xf32> to vector<4x256xf32>
    %16 = tpu.concatenate %13, %15 in 1 : vector<4x256xf32>, vector<4x256xf32> -> vector<4x512xf32>
    %c0_18 = arith.constant 0 : index
    %c0_19 = arith.constant 0 : index
    %17 = vector.load %arg2[%c0_18, %c0_19] : memref<32x2xf32, #tpu.memory_space<vmem>>, vector<32x2xf32>
    %18 = arith.negf %17 : vector<32x2xf32>
    %19 = math.exp %18 : vector<32x2xf32>
    %cst = arith.constant 1.000000e+00 : f32
    %20 = vector.broadcast %cst : f32 to vector<32x2xf32>
    %21 = arith.addf %20, %19 : vector<32x2xf32>
    %22 = arith.divf %20, %21 : vector<32x2xf32>
    %23 = arith.mulf %17, %22 : vector<32x2xf32>
    %cst_20 = arith.constant dense<0.000000e+00> : vector<16x2xf32>
    %24 = tpu.matmul %10, %23, %cst_20 {dimension_numbers = #tpu.dot_dimension_numbers<[1], [0], [0], [1], [0, 0, 1, 1], [], []>} : vector<16x32xf32>, vector<32x2xf32>, vector<16x2xf32> -> vector<16x2xf32>
    %25 = vector.broadcast %11 : vector<16x1xf32> to vector<16x2xf32>
    %26 = arith.addf %24, %25 : vector<16x2xf32>
    %27 = vector.extract_strided_slice %26 {offsets = [0, 0], sizes = [8, 2], strides = [1, 1]} : vector<16x2xf32> to vector<8x2xf32>
    %28 = vector.extract_strided_slice %26 {offsets = [8, 0], sizes = [8, 2], strides = [1, 1]} : vector<16x2xf32> to vector<8x2xf32>
    %c17_i32 = arith.constant 17 : i32
    %29 = tpu.dynamic_rotate %16 by %c17_i32 dim 1 : vector<4x512xf32>, i32 -> vector<4x512xf32>
    %c0_21 = arith.constant 0 : index
    %c0_22 = arith.constant 0 : index
    %30 = vector.load %arg5[%c0_21, %c0_22] : memref<9x512xf32, #tpu.memory_space<vmem>>, vector<1x512xf32>
    %31 = vector.broadcast %30 : vector<1x512xf32> to vector<4x512xf32>
    %32 = arith.mulf %29, %31 : vector<4x512xf32>
    %c0_23 = arith.constant 0 : index
    %c0_24 = arith.constant 0 : index
    %33 = vector.load %arg7[%c0_23, %c0_24] : memref<72x512xf32, #tpu.memory_space<vmem>>, vector<4x512xf32>
    tpu.vector_store %arg7[%c0_23, %c0_24], %32 {strides = array<i32>} : memref<72x512xf32, #tpu.memory_space<vmem>>, vector<4x512xf32>,
    %c16_i32 = arith.constant 16 : i32
    %34 = tpu.dynamic_rotate %16 by %c16_i32 dim 1 : vector<4x512xf32>, i32 -> vector<4x512xf32>
    %c1_25 = arith.constant 1 : index
    %c0_26 = arith.constant 0 : index
    %35 = vector.load %arg5[%c1_25, %c0_26] : memref<9x512xf32, #tpu.memory_space<vmem>>, vector<1x512xf32>
    %36 = vector.broadcast %35 : vector<1x512xf32> to vector<4x512xf32>
    %37 = arith.mulf %34, %36 : vector<4x512xf32>
    %c4 = arith.constant 4 : index
    %c0_27 = arith.constant 0 : index
    %38 = vector.load %arg7[%c4, %c0_27] : memref<72x512xf32, #tpu.memory_space<vmem>>, vector<4x512xf32>
    tpu.vector_store %arg7[%c4, %c0_27], %37 {strides = array<i32>} : memref<72x512xf32, #tpu.memory_space<vmem>>, vector<4x512xf32>,
    %c15_i32 = arith.constant 15 : i32
    %39 = tpu.dynamic_rotate %16 by %c15_i32 dim 1 : vector<4x512xf32>, i32 -> vector<4x512xf32>
    %c2 = arith.constant 2 : index
    %c0_28 = arith.constant 0 : index
    %40 = vector.load %arg5[%c2, %c0_28] : memref<9x512xf32, #tpu.memory_space<vmem>>, vector<1x512xf32>
    %41 = vector.broadcast %40 : vector<1x512xf32> to vector<4x512xf32>
    %42 = arith.mulf %39, %41 : vector<4x512xf32>
    %c8 = arith.constant 8 : index
    %c0_29 = arith.constant 0 : index
    %43 = vector.load %arg7[%c8, %c0_29] : memref<72x512xf32, #tpu.memory_space<vmem>>, vector<4x512xf32>
    tpu.vector_store %arg7[%c8, %c0_29], %42 {strides = array<i32>} : memref<72x512xf32, #tpu.memory_space<vmem>>, vector<4x512xf32>,
    %c1_i32 = arith.constant 1 : i32
    %44 = tpu.dynamic_rotate %16 by %c1_i32 dim 1 : vector<4x512xf32>, i32 -> vector<4x512xf32>
    %c3 = arith.constant 3 : index
    %c0_30 = arith.constant 0 : index
    %45 = vector.load %arg5[%c3, %c0_30] : memref<9x512xf32, #tpu.memory_space<vmem>>, vector<1x512xf32>
    %46 = vector.broadcast %45 : vector<1x512xf32> to vector<4x512xf32>
    %47 = arith.mulf %44, %46 : vector<4x512xf32>
    %c12 = arith.constant 12 : index
    %c0_31 = arith.constant 0 : index
    %48 = vector.load %arg7[%c12, %c0_31] : memref<72x512xf32, #tpu.memory_space<vmem>>, vector<4x512xf32>
    tpu.vector_store %arg7[%c12, %c0_31], %47 {strides = array<i32>} : memref<72x512xf32, #tpu.memory_space<vmem>>, vector<4x512xf32>,
    %c4_32 = arith.constant 4 : index
    %c0_33 = arith.constant 0 : index
    %49 = vector.load %arg5[%c4_32, %c0_33] : memref<9x512xf32, #tpu.memory_space<vmem>>, vector<1x512xf32>
    %50 = vector.broadcast %49 : vector<1x512xf32> to vector<4x512xf32>
    %51 = arith.mulf %16, %50 : vector<4x512xf32>
    %c16 = arith.constant 16 : index
    %c0_34 = arith.constant 0 : index
    %52 = vector.load %arg7[%c16, %c0_34] : memref<72x512xf32, #tpu.memory_space<vmem>>, vector<4x512xf32>
    tpu.vector_store %arg7[%c16, %c0_34], %51 {strides = array<i32>} : memref<72x512xf32, #tpu.memory_space<vmem>>, vector<4x512xf32>,
    %c511_i32 = arith.constant 511 : i32
    %53 = tpu.dynamic_rotate %16 by %c511_i32 dim 1 : vector<4x512xf32>, i32 -> vector<4x512xf32>
    %c5 = arith.constant 5 : index
    %c0_35 = arith.constant 0 : index
    %54 = vector.load %arg5[%c5, %c0_35] : memref<9x512xf32, #tpu.memory_space<vmem>>, vector<1x512xf32>
    %55 = vector.broadcast %54 : vector<1x512xf32> to vector<4x512xf32>
    %56 = arith.mulf %53, %55 : vector<4x512xf32>
    %c20 = arith.constant 20 : index
    %c0_36 = arith.constant 0 : index
    %57 = vector.load %arg7[%c20, %c0_36] : memref<72x512xf32, #tpu.memory_space<vmem>>, vector<4x512xf32>
    tpu.vector_store %arg7[%c20, %c0_36], %56 {strides = array<i32>} : memref<72x512xf32, #tpu.memory_space<vmem>>, vector<4x512xf32>,
    %c497_i32 = arith.constant 497 : i32
    %58 = tpu.dynamic_rotate %16 by %c497_i32 dim 1 : vector<4x512xf32>, i32 -> vector<4x512xf32>
    %c6 = arith.constant 6 : index
    %c0_37 = arith.constant 0 : index
    %59 = vector.load %arg5[%c6, %c0_37] : memref<9x512xf32, #tpu.memory_space<vmem>>, vector<1x512xf32>
    %60 = vector.broadcast %59 : vector<1x512xf32> to vector<4x512xf32>
    %61 = arith.mulf %58, %60 : vector<4x512xf32>
    %c24 = arith.constant 24 : index
    %c0_38 = arith.constant 0 : index
    %62 = vector.load %arg7[%c24, %c0_38] : memref<72x512xf32, #tpu.memory_space<vmem>>, vector<4x512xf32>
    tpu.vector_store %arg7[%c24, %c0_38], %61 {strides = array<i32>} : memref<72x512xf32, #tpu.memory_space<vmem>>, vector<4x512xf32>,
    %c496_i32 = arith.constant 496 : i32
    %63 = tpu.dynamic_rotate %16 by %c496_i32 dim 1 : vector<4x512xf32>, i32 -> vector<4x512xf32>
    %c7 = arith.constant 7 : index
    %c0_39 = arith.constant 0 : index
    %64 = vector.load %arg5[%c7, %c0_39] : memref<9x512xf32, #tpu.memory_space<vmem>>, vector<1x512xf32>
    %65 = vector.broadcast %64 : vector<1x512xf32> to vector<4x512xf32>
    %66 = arith.mulf %63, %65 : vector<4x512xf32>
    %c28 = arith.constant 28 : index
    %c0_40 = arith.constant 0 : index
    %67 = vector.load %arg7[%c28, %c0_40] : memref<72x512xf32, #tpu.memory_space<vmem>>, vector<4x512xf32>
    tpu.vector_store %arg7[%c28, %c0_40], %66 {strides = array<i32>} : memref<72x512xf32, #tpu.memory_space<vmem>>, vector<4x512xf32>,
    %c495_i32 = arith.constant 495 : i32
    %68 = tpu.dynamic_rotate %16 by %c495_i32 dim 1 : vector<4x512xf32>, i32 -> vector<4x512xf32>
    %c8_41 = arith.constant 8 : index
    %c0_42 = arith.constant 0 : index
    %69 = vector.load %arg5[%c8_41, %c0_42] : memref<9x512xf32, #tpu.memory_space<vmem>>, vector<1x512xf32>
    %70 = vector.broadcast %69 : vector<1x512xf32> to vector<4x512xf32>
    %71 = arith.mulf %68, %70 : vector<4x512xf32>
    %c32_43 = arith.constant 32 : index
    %c0_44 = arith.constant 0 : index
    %72 = vector.load %arg7[%c32_43, %c0_44] : memref<72x512xf32, #tpu.memory_space<vmem>>, vector<4x512xf32>
    tpu.vector_store %arg7[%c32_43, %c0_44], %71 {strides = array<i32>} : memref<72x512xf32, #tpu.memory_space<vmem>>, vector<4x512xf32>,
    %c0_45 = arith.constant 0 : index
    %c0_46 = arith.constant 0 : index
    %73 = vector.load %arg7[%c0_45, %c0_46] : memref<72x512xf32, #tpu.memory_space<vmem>>, vector<36x512xf32>
    %cst_47 = arith.constant dense<0.000000e+00> : vector<8x512xf32>
    %74 = tpu.matmul %0, %73, %cst_47 {dimension_numbers = #tpu.dot_dimension_numbers<[1], [0], [0], [1], [0, 0, 1, 1], [], []>} : vector<8x36xf32>, vector<36x512xf32>, vector<8x512xf32> -> vector<8x512xf32>
    %75 = vector.broadcast %2 : vector<8x1xf32> to vector<8x512xf32>
    %76 = arith.addf %74, %75 : vector<8x512xf32>
    %77 = vector.extract_strided_slice %76 {offsets = [0, 0], sizes = [8, 256], strides = [1, 1]} : vector<8x512xf32> to vector<8x256xf32>
    %cst_48 = arith.constant dense<0.000000e+00> : vector<8xf32>
    %78 = vector.multi_reduction <add>, %77, %cst_48 [1] : vector<8x256xf32> to vector<8xf32>
    %79 = vector.shape_cast %78 : vector<8xf32> to vector<8x1xf32>
    %cst_49 = arith.constant 2.560000e+02 : f32
    %80 = vector.broadcast %cst_49 : f32 to vector<8x1xf32>
    %81 = arith.divf %79, %80 : vector<8x1xf32>
    %82 = vector.broadcast %81 : vector<8x1xf32> to vector<8x256xf32>
    %83 = arith.subf %77, %82 : vector<8x256xf32>
    %84 = arith.mulf %83, %83 : vector<8x256xf32>
    %cst_50 = arith.constant dense<0.000000e+00> : vector<8xf32>
    %85 = vector.multi_reduction <add>, %84, %cst_50 [1] : vector<8x256xf32> to vector<8xf32>
    %86 = vector.shape_cast %85 : vector<8xf32> to vector<8x1xf32>
    %cst_51 = arith.constant 2.560000e+02 : f32
    %87 = vector.broadcast %cst_51 : f32 to vector<8x1xf32>
    %88 = arith.divf %86, %87 : vector<8x1xf32>
    %cst_52 = arith.constant 9.99999974E-6 : f32
    %89 = vector.broadcast %cst_52 : f32 to vector<8x1xf32>
    %90 = arith.addf %88, %89 : vector<8x1xf32>
    %91 = math.rsqrt %90 : vector<8x1xf32>
    %92 = vector.broadcast %91 : vector<8x1xf32> to vector<8x256xf32>
    %93 = arith.mulf %83, %92 : vector<8x256xf32>
    %94 = vector.broadcast %3 : vector<8x1xf32> to vector<8x256xf32>
    %95 = arith.mulf %93, %94 : vector<8x256xf32>
    %96 = vector.broadcast %4 : vector<8x1xf32> to vector<8x256xf32>
    %97 = arith.addf %95, %96 : vector<8x256xf32>
    %98 = vector.extract_strided_slice %27 {offsets = [0, 0], sizes = [8, 1], strides = [1, 1]} : vector<8x2xf32> to vector<8x1xf32>
    %cst_53 = arith.constant 1.000000e+00 : f32
    %99 = vector.broadcast %cst_53 : f32 to vector<8x1xf32>
    %100 = arith.addf %98, %99 : vector<8x1xf32>
    %101 = vector.broadcast %100 : vector<8x1xf32> to vector<8x256xf32>
    %102 = arith.mulf %97, %101 : vector<8x256xf32>
    %103 = vector.extract_strided_slice %28 {offsets = [0, 0], sizes = [8, 1], strides = [1, 1]} : vector<8x2xf32> to vector<8x1xf32>
    %104 = vector.broadcast %103 : vector<8x1xf32> to vector<8x256xf32>
    %105 = arith.addf %102, %104 : vector<8x256xf32>
    %106 = arith.negf %105 : vector<8x256xf32>
    %107 = math.exp %106 : vector<8x256xf32>
    %cst_54 = arith.constant 1.000000e+00 : f32
    %108 = vector.broadcast %cst_54 : f32 to vector<8x256xf32>
    %109 = arith.addf %108, %107 : vector<8x256xf32>
    %110 = arith.divf %108, %109 : vector<8x256xf32>
    %111 = arith.mulf %105, %110 : vector<8x256xf32>
    %112 = vector.extract_strided_slice %76 {offsets = [0, 256], sizes = [8, 256], strides = [1, 1]} : vector<8x512xf32> to vector<8x256xf32>
    %cst_55 = arith.constant dense<0.000000e+00> : vector<8xf32>
    %113 = vector.multi_reduction <add>, %112, %cst_55 [1] : vector<8x256xf32> to vector<8xf32>
    %114 = vector.shape_cast %113 : vector<8xf32> to vector<8x1xf32>
    %cst_56 = arith.constant 2.560000e+02 : f32
    %115 = vector.broadcast %cst_56 : f32 to vector<8x1xf32>
    %116 = arith.divf %114, %115 : vector<8x1xf32>
    %117 = vector.broadcast %116 : vector<8x1xf32> to vector<8x256xf32>
    %118 = arith.subf %112, %117 : vector<8x256xf32>
    %119 = arith.mulf %118, %118 : vector<8x256xf32>
    %cst_57 = arith.constant dense<0.000000e+00> : vector<8xf32>
    %120 = vector.multi_reduction <add>, %119, %cst_57 [1] : vector<8x256xf32> to vector<8xf32>
    %121 = vector.shape_cast %120 : vector<8xf32> to vector<8x1xf32>
    %cst_58 = arith.constant 2.560000e+02 : f32
    %122 = vector.broadcast %cst_58 : f32 to vector<8x1xf32>
    %123 = arith.divf %121, %122 : vector<8x1xf32>
    %cst_59 = arith.constant 9.99999974E-6 : f32
    %124 = vector.broadcast %cst_59 : f32 to vector<8x1xf32>
    %125 = arith.addf %123, %124 : vector<8x1xf32>
    %126 = math.rsqrt %125 : vector<8x1xf32>
    %127 = vector.broadcast %126 : vector<8x1xf32> to vector<8x256xf32>
    %128 = arith.mulf %118, %127 : vector<8x256xf32>
    %129 = vector.broadcast %3 : vector<8x1xf32> to vector<8x256xf32>
    %130 = arith.mulf %128, %129 : vector<8x256xf32>
    %131 = vector.broadcast %4 : vector<8x1xf32> to vector<8x256xf32>
    %132 = arith.addf %130, %131 : vector<8x256xf32>
    %133 = vector.extract_strided_slice %27 {offsets = [0, 1], sizes = [8, 1], strides = [1, 1]} : vector<8x2xf32> to vector<8x1xf32>
    %cst_60 = arith.constant 1.000000e+00 : f32
    %134 = vector.broadcast %cst_60 : f32 to vector<8x1xf32>
    %135 = arith.addf %133, %134 : vector<8x1xf32>
    %136 = vector.broadcast %135 : vector<8x1xf32> to vector<8x256xf32>
    %137 = arith.mulf %132, %136 : vector<8x256xf32>
    %138 = vector.extract_strided_slice %28 {offsets = [0, 1], sizes = [8, 1], strides = [1, 1]} : vector<8x2xf32> to vector<8x1xf32>
    %139 = vector.broadcast %138 : vector<8x1xf32> to vector<8x256xf32>
    %140 = arith.addf %137, %139 : vector<8x256xf32>
    %141 = arith.negf %140 : vector<8x256xf32>
    %142 = math.exp %141 : vector<8x256xf32>
    %cst_61 = arith.constant 1.000000e+00 : f32
    %143 = vector.broadcast %cst_61 : f32 to vector<8x256xf32>
    %144 = arith.addf %143, %142 : vector<8x256xf32>
    %145 = arith.divf %143, %144 : vector<8x256xf32>
    %146 = arith.mulf %140, %145 : vector<8x256xf32>
    %147 = tpu.concatenate %111, %146 in 1 : vector<8x256xf32>, vector<8x256xf32> -> vector<8x512xf32>
    %c17_i32_62 = arith.constant 17 : i32
    %148 = tpu.dynamic_rotate %147 by %c17_i32_62 dim 1 : vector<8x512xf32>, i32 -> vector<8x512xf32>
    %c0_63 = arith.constant 0 : index
    %c0_64 = arith.constant 0 : index
    %149 = vector.load %arg5[%c0_63, %c0_64] : memref<9x512xf32, #tpu.memory_space<vmem>>, vector<1x512xf32>
    %150 = vector.broadcast %149 : vector<1x512xf32> to vector<8x512xf32>
    %151 = arith.mulf %148, %150 : vector<8x512xf32>
    %c0_65 = arith.constant 0 : index
    %c0_66 = arith.constant 0 : index
    %152 = vector.load %arg7[%c0_65, %c0_66] : memref<72x512xf32, #tpu.memory_space<vmem>>, vector<8x512xf32>
    tpu.vector_store %arg7[%c0_65, %c0_66], %151 {strides = array<i32>} : memref<72x512xf32, #tpu.memory_space<vmem>>, vector<8x512xf32>,
    %c16_i32_67 = arith.constant 16 : i32
    %153 = tpu.dynamic_rotate %147 by %c16_i32_67 dim 1 : vector<8x512xf32>, i32 -> vector<8x512xf32>
    %c1_68 = arith.constant 1 : index
    %c0_69 = arith.constant 0 : index
    %154 = vector.load %arg5[%c1_68, %c0_69] : memref<9x512xf32, #tpu.memory_space<vmem>>, vector<1x512xf32>
    %155 = vector.broadcast %154 : vector<1x512xf32> to vector<8x512xf32>
    %156 = arith.mulf %153, %155 : vector<8x512xf32>
    %c8_70 = arith.constant 8 : index
    %c0_71 = arith.constant 0 : index
    %157 = vector.load %arg7[%c8_70, %c0_71] : memref<72x512xf32, #tpu.memory_space<vmem>>, vector<8x512xf32>
    tpu.vector_store %arg7[%c8_70, %c0_71], %156 {strides = array<i32>} : memref<72x512xf32, #tpu.memory_space<vmem>>, vector<8x512xf32>,
    %c15_i32_72 = arith.constant 15 : i32
    %158 = tpu.dynamic_rotate %147 by %c15_i32_72 dim 1 : vector<8x512xf32>, i32 -> vector<8x512xf32>
    %c2_73 = arith.constant 2 : index
    %c0_74 = arith.constant 0 : index
    %159 = vector.load %arg5[%c2_73, %c0_74] : memref<9x512xf32, #tpu.memory_space<vmem>>, vector<1x512xf32>
    %160 = vector.broadcast %159 : vector<1x512xf32> to vector<8x512xf32>
    %161 = arith.mulf %158, %160 : vector<8x512xf32>
    %c16_75 = arith.constant 16 : index
    %c0_76 = arith.constant 0 : index
    %162 = vector.load %arg7[%c16_75, %c0_76] : memref<72x512xf32, #tpu.memory_space<vmem>>, vector<8x512xf32>
    tpu.vector_store %arg7[%c16_75, %c0_76], %161 {strides = array<i32>} : memref<72x512xf32, #tpu.memory_space<vmem>>, vector<8x512xf32>,
    %c1_i32_77 = arith.constant 1 : i32
    %163 = tpu.dynamic_rotate %147 by %c1_i32_77 dim 1 : vector<8x512xf32>, i32 -> vector<8x512xf32>
    %c3_78 = arith.constant 3 : index
    %c0_79 = arith.constant 0 : index
    %164 = vector.load %arg5[%c3_78, %c0_79] : memref<9x512xf32, #tpu.memory_space<vmem>>, vector<1x512xf32>
    %165 = vector.broadcast %164 : vector<1x512xf32> to vector<8x512xf32>
    %166 = arith.mulf %163, %165 : vector<8x512xf32>
    %c24_80 = arith.constant 24 : index
    %c0_81 = arith.constant 0 : index
    %167 = vector.load %arg7[%c24_80, %c0_81] : memref<72x512xf32, #tpu.memory_space<vmem>>, vector<8x512xf32>
    tpu.vector_store %arg7[%c24_80, %c0_81], %166 {strides = array<i32>} : memref<72x512xf32, #tpu.memory_space<vmem>>, vector<8x512xf32>,
    %c4_82 = arith.constant 4 : index
    %c0_83 = arith.constant 0 : index
    %168 = vector.load %arg5[%c4_82, %c0_83] : memref<9x512xf32, #tpu.memory_space<vmem>>, vector<1x512xf32>
    %169 = vector.broadcast %168 : vector<1x512xf32> to vector<8x512xf32>
    %170 = arith.mulf %147, %169 : vector<8x512xf32>
    %c32_84 = arith.constant 32 : index
    %c0_85 = arith.constant 0 : index
    %171 = vector.load %arg7[%c32_84, %c0_85] : memref<72x512xf32, #tpu.memory_space<vmem>>, vector<8x512xf32>
    tpu.vector_store %arg7[%c32_84, %c0_85], %170 {strides = array<i32>} : memref<72x512xf32, #tpu.memory_space<vmem>>, vector<8x512xf32>,
    %c511_i32_86 = arith.constant 511 : i32
    %172 = tpu.dynamic_rotate %147 by %c511_i32_86 dim 1 : vector<8x512xf32>, i32 -> vector<8x512xf32>
    %c5_87 = arith.constant 5 : index
    %c0_88 = arith.constant 0 : index
    %173 = vector.load %arg5[%c5_87, %c0_88] : memref<9x512xf32, #tpu.memory_space<vmem>>, vector<1x512xf32>
    %174 = vector.broadcast %173 : vector<1x512xf32> to vector<8x512xf32>
    %175 = arith.mulf %172, %174 : vector<8x512xf32>
    %c40_89 = arith.constant 40 : index
    %c0_90 = arith.constant 0 : index
    %176 = vector.load %arg7[%c40_89, %c0_90] : memref<72x512xf32, #tpu.memory_space<vmem>>, vector<8x512xf32>
    tpu.vector_store %arg7[%c40_89, %c0_90], %175 {strides = array<i32>} : memref<72x512xf32, #tpu.memory_space<vmem>>, vector<8x512xf32>,
    %c497_i32_91 = arith.constant 497 : i32
    %177 = tpu.dynamic_rotate %147 by %c497_i32_91 dim 1 : vector<8x512xf32>, i32 -> vector<8x512xf32>
    %c6_92 = arith.constant 6 : index
    %c0_93 = arith.constant 0 : index
    %178 = vector.load %arg5[%c6_92, %c0_93] : memref<9x512xf32, #tpu.memory_space<vmem>>, vector<1x512xf32>
    %179 = vector.broadcast %178 : vector<1x512xf32> to vector<8x512xf32>
    %180 = arith.mulf %177, %179 : vector<8x512xf32>
    %c48 = arith.constant 48 : index
    %c0_94 = arith.constant 0 : index
    %181 = vector.load %arg7[%c48, %c0_94] : memref<72x512xf32, #tpu.memory_space<vmem>>, vector<8x512xf32>
    tpu.vector_store %arg7[%c48, %c0_94], %180 {strides = array<i32>} : memref<72x512xf32, #tpu.memory_space<vmem>>, vector<8x512xf32>,
    %c496_i32_95 = arith.constant 496 : i32
    %182 = tpu.dynamic_rotate %147 by %c496_i32_95 dim 1 : vector<8x512xf32>, i32 -> vector<8x512xf32>
    %c7_96 = arith.constant 7 : index
    %c0_97 = arith.constant 0 : index
    %183 = vector.load %arg5[%c7_96, %c0_97] : memref<9x512xf32, #tpu.memory_space<vmem>>, vector<1x512xf32>
    %184 = vector.broadcast %183 : vector<1x512xf32> to vector<8x512xf32>
    %185 = arith.mulf %182, %184 : vector<8x512xf32>
    %c56 = arith.constant 56 : index
    %c0_98 = arith.constant 0 : index
    %186 = vector.load %arg7[%c56, %c0_98] : memref<72x512xf32, #tpu.memory_space<vmem>>, vector<8x512xf32>
    tpu.vector_store %arg7[%c56, %c0_98], %185 {strides = array<i32>} : memref<72x512xf32, #tpu.memory_space<vmem>>, vector<8x512xf32>,
    %c495_i32_99 = arith.constant 495 : i32
    %187 = tpu.dynamic_rotate %147 by %c495_i32_99 dim 1 : vector<8x512xf32>, i32 -> vector<8x512xf32>
    %c8_100 = arith.constant 8 : index
    %c0_101 = arith.constant 0 : index
    %188 = vector.load %arg5[%c8_100, %c0_101] : memref<9x512xf32, #tpu.memory_space<vmem>>, vector<1x512xf32>
    %189 = vector.broadcast %188 : vector<1x512xf32> to vector<8x512xf32>
    %190 = arith.mulf %187, %189 : vector<8x512xf32>
    %c64 = arith.constant 64 : index
    %c0_102 = arith.constant 0 : index
    %191 = vector.load %arg7[%c64, %c0_102] : memref<72x512xf32, #tpu.memory_space<vmem>>, vector<8x512xf32>
    tpu.vector_store %arg7[%c64, %c0_102], %190 {strides = array<i32>} : memref<72x512xf32, #tpu.memory_space<vmem>>, vector<8x512xf32>,
    %c0_103 = arith.constant 0 : index
    %c0_104 = arith.constant 0 : index
    %192 = vector.load %arg7[%c0_103, %c0_104] : memref<72x512xf32, #tpu.memory_space<vmem>>, vector<72x512xf32>
    %cst_105 = arith.constant dense<0.000000e+00> : vector<8x512xf32>
    %193 = tpu.matmul %9, %192, %cst_105 {dimension_numbers = #tpu.dot_dimension_numbers<[1], [0], [0], [1], [0, 0, 1, 1], [], []>} : vector<8x72xf32>, vector<72x512xf32>, vector<8x512xf32> -> vector<8x512xf32>
    %194 = vector.broadcast %5 : vector<8x1xf32> to vector<8x512xf32>
    %195 = arith.addf %193, %194 : vector<8x512xf32>
    %196 = vector.extract_strided_slice %195 {offsets = [0, 0], sizes = [8, 256], strides = [1, 1]} : vector<8x512xf32> to vector<8x256xf32>
    %cst_106 = arith.constant dense<0.000000e+00> : vector<8xf32>
    %197 = vector.multi_reduction <add>, %196, %cst_106 [1] : vector<8x256xf32> to vector<8xf32>
    %198 = vector.shape_cast %197 : vector<8xf32> to vector<8x1xf32>
    %cst_107 = arith.constant 2.560000e+02 : f32
    %199 = vector.broadcast %cst_107 : f32 to vector<8x1xf32>
    %200 = arith.divf %198, %199 : vector<8x1xf32>
    %201 = vector.broadcast %200 : vector<8x1xf32> to vector<8x256xf32>
    %202 = arith.subf %196, %201 : vector<8x256xf32>
    %203 = arith.mulf %202, %202 : vector<8x256xf32>
    %cst_108 = arith.constant dense<0.000000e+00> : vector<8xf32>
    %204 = vector.multi_reduction <add>, %203, %cst_108 [1] : vector<8x256xf32> to vector<8xf32>
    %205 = vector.shape_cast %204 : vector<8xf32> to vector<8x1xf32>
    %cst_109 = arith.constant 2.560000e+02 : f32
    %206 = vector.broadcast %cst_109 : f32 to vector<8x1xf32>
    %207 = arith.divf %205, %206 : vector<8x1xf32>
    %cst_110 = arith.constant 9.99999974E-6 : f32
    %208 = vector.broadcast %cst_110 : f32 to vector<8x1xf32>
    %209 = arith.addf %207, %208 : vector<8x1xf32>
    %210 = math.rsqrt %209 : vector<8x1xf32>
    %211 = vector.broadcast %210 : vector<8x1xf32> to vector<8x256xf32>
    %212 = arith.mulf %202, %211 : vector<8x256xf32>
    %213 = vector.broadcast %6 : vector<8x1xf32> to vector<8x256xf32>
    %214 = arith.mulf %212, %213 : vector<8x256xf32>
    %215 = vector.broadcast %7 : vector<8x1xf32> to vector<8x256xf32>
    %216 = arith.addf %214, %215 : vector<8x256xf32>
    %217 = arith.negf %216 : vector<8x256xf32>
    %218 = math.exp %217 : vector<8x256xf32>
    %cst_111 = arith.constant 1.000000e+00 : f32
    %219 = vector.broadcast %cst_111 : f32 to vector<8x256xf32>
    %220 = arith.addf %219, %218 : vector<8x256xf32>
    %221 = arith.divf %219, %220 : vector<8x256xf32>
    %222 = arith.mulf %216, %221 : vector<8x256xf32>
    %223 = vector.extract_strided_slice %195 {offsets = [0, 256], sizes = [8, 256], strides = [1, 1]} : vector<8x512xf32> to vector<8x256xf32>
    %cst_112 = arith.constant dense<0.000000e+00> : vector<8xf32>
    %224 = vector.multi_reduction <add>, %223, %cst_112 [1] : vector<8x256xf32> to vector<8xf32>
    %225 = vector.shape_cast %224 : vector<8xf32> to vector<8x1xf32>
    %cst_113 = arith.constant 2.560000e+02 : f32
    %226 = vector.broadcast %cst_113 : f32 to vector<8x1xf32>
    %227 = arith.divf %225, %226 : vector<8x1xf32>
    %228 = vector.broadcast %227 : vector<8x1xf32> to vector<8x256xf32>
    %229 = arith.subf %223, %228 : vector<8x256xf32>
    %230 = arith.mulf %229, %229 : vector<8x256xf32>
    %cst_114 = arith.constant dense<0.000000e+00> : vector<8xf32>
    %231 = vector.multi_reduction <add>, %230, %cst_114 [1] : vector<8x256xf32> to vector<8xf32>
    %232 = vector.shape_cast %231 : vector<8xf32> to vector<8x1xf32>
    %cst_115 = arith.constant 2.560000e+02 : f32
    %233 = vector.broadcast %cst_115 : f32 to vector<8x1xf32>
    %234 = arith.divf %232, %233 : vector<8x1xf32>
    %cst_116 = arith.constant 9.99999974E-6 : f32
    %235 = vector.broadcast %cst_116 : f32 to vector<8x1xf32>
    %236 = arith.addf %234, %235 : vector<8x1xf32>
    %237 = math.rsqrt %236 : vector<8x1xf32>
    %238 = vector.broadcast %237 : vector<8x1xf32> to vector<8x256xf32>
    %239 = arith.mulf %229, %238 : vector<8x256xf32>
    %240 = vector.broadcast %6 : vector<8x1xf32> to vector<8x256xf32>
    %241 = arith.mulf %239, %240 : vector<8x256xf32>
    %242 = vector.broadcast %7 : vector<8x1xf32> to vector<8x256xf32>
    %243 = arith.addf %241, %242 : vector<8x256xf32>
    %244 = arith.negf %243 : vector<8x256xf32>
    %245 = math.exp %244 : vector<8x256xf32>
    %cst_117 = arith.constant 1.000000e+00 : f32
    %246 = vector.broadcast %cst_117 : f32 to vector<8x256xf32>
    %247 = arith.addf %246, %245 : vector<8x256xf32>
    %248 = arith.divf %246, %247 : vector<8x256xf32>
    %249 = arith.mulf %243, %248 : vector<8x256xf32>
    %250 = tpu.concatenate %222, %249 in 1 : vector<8x256xf32>, vector<8x256xf32> -> vector<8x512xf32>
    %cst_118 = arith.constant dense<0.000000e+00> : vector<8x512xf32>
    %251 = tpu.matmul %1, %16, %cst_118 {dimension_numbers = #tpu.dot_dimension_numbers<[1], [0], [0], [1], [0, 0, 1, 1], [], []>} : vector<8x4xf32>, vector<4x512xf32>, vector<8x512xf32> -> vector<8x512xf32>
    %252 = vector.broadcast %8 : vector<8x1xf32> to vector<8x512xf32>
    %253 = arith.addf %251, %252 : vector<8x512xf32>
    %254 = arith.addf %250, %253 : vector<8x512xf32>
    %255 = vector.extract_strided_slice %254 {offsets = [0, 0], sizes = [8, 256], strides = [1, 1]} : vector<8x512xf32> to vector<8x256xf32>
    %c0_119 = arith.constant 0 : index
    %c0_120 = arith.constant 0 : index
    %c0_121 = arith.constant 0 : index
    %256 = vector.load %arg6[%c0_119, %c0_120, %c0_121] : memref<2x8x256xf32, #tpu.memory_space<vmem>>, vector<1x8x256xf32>
    %257 = vector.shape_cast %256 : vector<1x8x256xf32> to vector<8x256xf32>
    %258 = vector.shape_cast %255 : vector<8x256xf32> to vector<1x8x256xf32>
    tpu.vector_store %arg6[%c0_119, %c0_120, %c0_121], %258 {strides = array<i32>} : memref<2x8x256xf32, #tpu.memory_space<vmem>>, vector<1x8x256xf32>,
    %259 = vector.extract_strided_slice %254 {offsets = [0, 256], sizes = [8, 256], strides = [1, 1]} : vector<8x512xf32> to vector<8x256xf32>
    %c1_122 = arith.constant 1 : index
    %c0_123 = arith.constant 0 : index
    %c0_124 = arith.constant 0 : index
    %260 = vector.load %arg6[%c1_122, %c0_123, %c0_124] : memref<2x8x256xf32, #tpu.memory_space<vmem>>, vector<1x8x256xf32>
    %261 = vector.shape_cast %260 : vector<1x8x256xf32> to vector<8x256xf32>
    %262 = vector.shape_cast %259 : vector<8x256xf32> to vector<1x8x256xf32>
    tpu.vector_store %arg6[%c1_122, %c0_123, %c0_124], %262 {strides = array<i32>} : memref<2x8x256xf32, #tpu.memory_space<vmem>>, vector<1x8x256xf32>,
    return
  }
  func.func @transform_0(%arg0: i32) -> (i32, i32, i32) {
    %c0_i32 = arith.constant 0 : i32
    %c0_i32_0 = arith.constant 0 : i32
    %c0_i32_1 = arith.constant 0 : i32
    %c0_i32_2 = arith.constant 0 : i32
    return %c0_i32, %c0_i32_0, %c0_i32_1 : i32, i32, i32
  }
  func.func @transform_1(%arg0: i32) -> (i32, i32) {
    %c0_i32 = arith.constant 0 : i32
    %c0_i32_0 = arith.constant 0 : i32
    %c0_i32_1 = arith.constant 0 : i32
    return %c0_i32, %c0_i32_0 : i32, i32
  }
  func.func @transform_2(%arg0: i32) -> (i32, i32) {
    %c0_i32 = arith.constant 0 : i32
    %c0_i32_0 = arith.constant 0 : i32
    %c0_i32_1 = arith.constant 0 : i32
    return %c0_i32, %c0_i32_0 : i32, i32
  }
  func.func @transform_3(%arg0: i32) -> (i32, i32) {
    %c0_i32 = arith.constant 0 : i32
    %c0_i32_0 = arith.constant 0 : i32
    %c0_i32_1 = arith.constant 0 : i32
    return %c0_i32, %c0_i32_0 : i32, i32
  }
  func.func @transform_4(%arg0: i32) -> (i32, i32) {
    %c0_i32 = arith.constant 0 : i32
    %c0_i32_0 = arith.constant 0 : i32
    %c0_i32_1 = arith.constant 0 : i32
    return %c0_i32, %c0_i32_0 : i32, i32
  }
  func.func @transform_5(%arg0: i32) -> (i32, i32, i32) {
    %c0_i32 = arith.constant 0 : i32
    %c0_i32_0 = arith.constant 0 : i32
    %c0_i32_1 = arith.constant 0 : i32
    %c0_i32_2 = arith.constant 0 : i32
    return %c0_i32, %c0_i32_0, %c0_i32_1 : i32, i32, i32
  }
}

</mosaic_0001>

<bundles_post_ra>
// kernel: tpu_custom_call.1
= control target key start
LH: loop header
LB: loop body
LE: loop exit
PB: predicated region body
PF: predicated region fallthrough
CT: control target
= control target key end

     0   :  { %10 = vsyncpa [#allocation4], 0  ;;  %s2437_s0 = inlined_call_operand.vmem [shape: f32[2,4,256], index: 0, kind: input, shape index: {}]   ;;  %s2438_s1 = inlined_call_operand.vmem [shape: f32[32,2], index: 1, kind: input, shape index: {}]   ;;  %s2439_s2 = inlined_call_operand.vmem [shape: f32[8,256], index: 2, kind: input, shape index: {}]   ;;  %s2440_s3 = inlined_call_operand.hbm [shape: f32[16,33], index: 3, kind: input, shape index: {}]   ;;  %s2441_s4 = inlined_call_operand.hbm [shape: f32[9,512], index: 4, kind: input, shape index: {}]   ;;  %s2442_s5 = inlined_call_operand.hbm [shape: f32[2,8,256], index: 5, kind: output, shape index: {}]  }
   0x1   :  { %11 = vsyncpa [#allocation7], 0 }
   0x2   :  { %12 = vsyncpa [#allocation5], 0  ;;  %s1931_s18 = smov [#allocation3]  }
   0x3   :  { %s24_s19 = sshll.u32 %s1931_s18, 4  ;;  %s25_s19 = int_to_ptr.vmem [resolvable:$true] %s24_s19 }
   0x4   :  { %s1873_s20 = scalar_lea.vmem %s25_s19, 256  ;;  %p1878_p1 = scmp.lt.s32.totalorder %s25_s19, %s25_s19 }
   0x5   :  { %p1874_p0 = scmp.ne.s32.totalorder %s25_s19, %s1873_s20  ;;  %p1879_p2 = scmp.lt.s32.totalorder %s1873_s20, %s1873_s20 }
   0x7   :  { %p1880_p3 = por %p1879_p2, %p1878_p1 }
   0x9   :  { %p1881_p4 = pnand %p1880_p3, %p1874_p0 }
   0xb   :  { %1884 = shalt.err (!%p1881_p4)
}
   0xc   :  { %s1932_s21 = smov 128   ;;  %s1933_s22 = smov 8  }
   0xd   :  { %30 = dma.hbm_to_vmem [thread:$0]  %s2440_s3, 256, %s25_s19, [#allocation4], %s1932_s21, %s1932_s21, %s1933_s22  }
   0xe   :  { %s1934_s25 = smov [#allocation6]  }
   0xf   :  { %s36_s26 = sshll.u32 %s1934_s25, 4  ;;  %s37_s26 = int_to_ptr.vmem [resolvable:$true] %s36_s26 }
  0x10   :  { %s1893_s27 = scalar_lea.vmem %s37_s26, 1024  ;;  %p1898_p6 = scmp.lt.s32.totalorder %s37_s26, %s37_s26 }
  0x11   :  { %p1894_p5 = scmp.ne.s32.totalorder %s37_s26, %s1893_s27  ;;  %p1899_p7 = scmp.lt.s32.totalorder %s1893_s27, %s1893_s27 }
  0x13   :  { %p1900_p8 = por %p1899_p7, %p1898_p6 }
  0x15   :  { %p1901_p9 = pnand %p1900_p8, %p1894_p5 }
  0x17   :  { %1904 = shalt.err (!%p1901_p9)
}
  0x18   :  { %s1935_s28 = smov 512   ;;  %s1936_s29 = smov 32  }
  0x19   :  { %42 = dma.hbm_to_vmem [thread:$0]  %s2441_s4, 1024, %s37_s26, [#allocation7], %s1935_s28, %s1935_s28, %s1936_s29  }
  0x1a   :  { %1925 = dma.done.wait [#allocation4], 256  }
  0x1b   :  { %1926 = vsyncadd [#allocation4], 4294967040 }
  0x1c   :  { %1927 = dma.done.wait [#allocation7], 1024  }
  0x1d   :  { %1928 = vsyncadd [#allocation7], 4294966272  ;;  %v192_v0 = vlaneseq  ;;  %v1998_v1 = vld [vmem:[%s2437_s0 + $0x8] sm:$0xff]  ;;  %v2003_v2 = vld [vmem:[%s2437_s0] sm:$0xff]  ;;  %s1937_s10 = smov 112   ;;  %s1938_s18 = smov 111  }
  0x1e   :  { %520 = vrot.lane.b32.xlu1 %v1998_v1, %s1937_s10  ;;  %516 = vrot.lane.b32.xlu0 %v2003_v2, %s1937_s10  ;;  %v2011_v3 = vcombine.high %v1998_v1, %v1998_v1  ;;  %v2016_v4 = vld [vmem:[%s2438_s1 + $0x18] sm:$0xff]  ;;  %v2021_v5 = vld [vmem:[%s2438_s1 + $0x10] sm:$0xff]  ;;  %v2045_v13 = vcombine.high %v2003_v2, %v2003_v2  ;;  %v2063_v24 = vld [vmem:[#allocation3] sm:$0xff]  ;;  %vm104_vm0 = vcmask 261120   ;;  %s1940_s19 = smov 113   ;;  %s1941_s20 = smov 1  }
  0x1f   :  { %v202_v6 = vshrl.u32 %v192_v0, 7  ;;  %v2027_v7 = vld [vmem:[%s2438_s1 + $0x8] sm:$0xff]  ;;  %v2032_v8 = vld [vmem:[%s2438_s1] sm:$0xff]  ;;  %v1721_v9 = vmul.f32 -1.442695, %v2016_v4  ;;  %1760 = vmatprep.mubr.msk.f32.mxu0 %vm104_vm0, %v2063_v24  ;;  %s1939_s1 = smov 127  }
  0x20   :  { %v1720_v11 = vmul.f32 -1.442695, %v2021_v5  ;;  %v1719_v12 = vmul.f32 -1.442695, %v2027_v7  ;;  %v1718_v14 = vmul.f32 -1.442695, %v2032_v8 }
  0x21   :  { %v2035_v10 = vsub.s32 0, %v202_v6  ;;  %1806 = vpow2.f32 %v1721_v9  ;;  %v386_v15 = vld [vmem:[#allocation6 + $0x4] ss:$8 sm:$0xf]  ;;  %v2049_v17 = vsub.s32 1, %v202_v6  ;;  %v2051_v18 = vsub.s32 2, %v202_v6 }
  0x22   :  { %522 = vrot.lane.b32.xlu1 %v2011_v3, %s1937_s10  ;;  %572 = vrot.lane.b32.xlu0 %v2003_v2, %s1938_s18  ;;  %1808 = vpow2.f32 %v1720_v11  ;;  %v2053_v19 = vsub.s32 3, %v202_v6  ;;  %s1942_s21 = smov 16   ;;  %v2110_v44 = vld [vmem:[#allocation3 + $0x8] sm:$0xff]  ;;  %s1943_s22 = smov 15   ;;  %v1945_v45 = vmov 0.0   ;;  %v1946_v46 = vmov 40  }
  0x23   :  { %v391_v16 = vrot.slane %v386_v15, %v2035_v10  ;;  %1810 = vpow2.f32 %v1719_v12  ;;  %v395_v21 = vrot.slane %v386_v15, %v2049_v17  ;;  %v399_v23 = vrot.slane %v386_v15, %v2051_v18  ;;  %s1944_s23 = smov 17   ;;  %721 = vmatprep.mubr.f32.mxu1 %v1945_v45  ;;  %1791 = vset.pattern.permute.xlu0 %v1946_v46  ;;  %v2135_v47 = vld [vmem:[%s2439_s2] sm:$0xff]  ;;  %s1953_s26 = smov 92  }
  0x24   :  { %1812 = vpow2.f32 %v1718_v14  ;;  %v403_v22 = vrot.slane %v386_v15, %v2053_v19  ;;  %v2139_v48 = vand.u32 127, %v192_v0  ;;  %v530_v49 = vld [vmem:[#allocation6 + $0x7] ss:$8 sm:$0xf]  ;;  %vm644_vm4 = vcmask 1043456  }
  0x25   :  { %v408_v20 = vmul.f32 %v391_v16, %v2003_v2  ;;  %v409_v25 = vmul.f32 %v395_v21, %v2045_v13  ;;  %v410_v27 = vmul.f32 %v1998_v1, %v399_v23  ;;  %v543_v52 = vrot.slane %v530_v49, %v2051_v18  ;;  %v586_v54 = vld [vmem:[#allocation6 + $0x20] ss:$8 sm:$0xf]  ;;  %v430_v16 = vld [vmem:[#allocation6 + $0x5] ss:$8 sm:$0xf] }
  0x26   :  { %574 = vrot.lane.b32.xlu1 %v2045_v13, %s1938_s18  ;;  %518 = vrot.lane.b32.xlu0 %v2045_v13, %s1937_s10  ;;  %v411_v26 = vmul.f32 %v403_v22, %v2011_v3  ;;  %vm524_vm1 = vcmp.lt.s32.totalorder %v2139_v48, 112  ;;  %v547_v53 = vrot.slane %v530_v49, %v2053_v19  ;;  %vm580_vm2 = vcmp.lt.s32.totalorder %v2139_v48, 111 }
  0x27   :  { %412 = vst [vmem:[#allocation2 + $0x80] sm:$0xf] %v408_v20  ;;  %413 = vst [vmem:[#allocation2 + $0x110] sm:$0xf] %v409_v25  ;;  %v591_v59 = vrot.slane %v586_v54, %v2035_v10  ;;  %v535_v62 = vrot.slane %v530_v49, %v2035_v10  ;;  %v539_v63 = vrot.slane %v530_v49, %v2049_v17  ;;  %vm424_vm3 = vcmp.lt.s32.totalorder %v2139_v48, 127 }
  0x28   :  { %415 = vst [vmem:[#allocation2 + $0x98] sm:$0xf] %v411_v26  ;;  %414 = vst [vmem:[#allocation2 + $0x118] sm:$0xf] %v410_v27  ;;  %v595_v9 = vrot.slane %v586_v54, %v2049_v17  ;;  %v599_v15 = vrot.slane %v586_v54, %v2051_v18  ;;  %vm480_vm5 = vcmp.lt.s32.totalorder %v2139_v48, 113  ;;  %vm337_vm6 = vcmp.lt.s32.totalorder %v2139_v48, 1 }
  0x29   :  { %vm237_vm7 = vcmp.lt.s32.totalorder %v2139_v48, 16  ;;  %vm293_vm8 = vcmp.lt.s32.totalorder %v2139_v48, 15  ;;  %vm194_vm9 = vcmp.lt.s32.totalorder %v2139_v48, 17  ;;  %vm641_vm10 = vcmask 293888  }
  0x2a   :  { %578 = vrot.lane.b32.xlu1 %v2011_v3, %s1938_s18  ;;  %576 = vrot.lane.b32.xlu0 %v1998_v1, %s1938_s18  ;;  %vm1309_vm11 = vcmask 588800   ;;  %vm1537_vm12 = vcmask 31744  }
  0x2e   :  { %418 = vrot.lane.b32.xlu1 %v2045_v13, %s1939_s1  ;;  %416 = vrot.lane.b32.xlu0 %v2003_v2, %s1939_s1  ;;  %v1807_v28 = vpop.eup %1806 }
  0x2f   :  { %v1809_v29 = vpop.eup %1808  ;;  %v81_v30 = vadd.f32 1.0, %v1807_v28 }
  0x30   :  { %v1811_v31 = vpop.eup %1810  ;;  %v80_v32 = vadd.f32 1.0, %v1809_v29 }
  0x31   :  { %v1813_v33 = vpop.eup %1812  ;;  %1814 = vrcp.f32 %v81_v30  ;;  %v79_v34 = vadd.f32 1.0, %v1811_v31  ;;  %v435_v31 = vrot.slane %v430_v16, %v2035_v10 }
  0x32   :  { %422 = vrot.lane.b32.xlu1 %v2011_v3, %s1939_s1  ;;  %420 = vrot.lane.b32.xlu0 %v1998_v1, %s1939_s1  ;;  %1816 = vrcp.f32 %v80_v32  ;;  %v78_v35 = vadd.f32 1.0, %v1813_v33 }
  0x33   :  { %1818 = vrcp.f32 %v79_v34 }
  0x34   :  { %1820 = vrcp.f32 %v78_v35 }
  0x36   :  { %474 = vrot.lane.b32.xlu1 %v2045_v13, %s1940_s19  ;;  %472 = vrot.lane.b32.xlu0 %v2003_v2, %s1940_s19 }
  0x3a   :  { %478 = vrot.lane.b32.xlu1 %v2011_v3, %s1940_s19  ;;  %476 = vrot.lane.b32.xlu0 %v1998_v1, %s1940_s19 }
  0x3e   :  { %331 = vrot.lane.b32.xlu1 %v2045_v13, %s1941_s20  ;;  %329 = vrot.lane.b32.xlu0 %v2003_v2, %s1941_s20  ;;  %v1815_v36 = vpop.eup %1814 }
  0x3f   :  { %v1817_v37 = vpop.eup %1816  ;;  %v93_v38 = vmul.f32 %v1815_v36, %v2016_v4  ;;  %v447_v36 = vrot.slane %v430_v16, %v2053_v19 }
  0x40   :  { %v1819_v39 = vpop.eup %1818  ;;  %v92_v40 = vmul.f32 %v1817_v37, %v2021_v5  ;;  %v603_v5 = vrot.slane %v586_v54, %v2053_v19  ;;  %v439_v37 = vrot.slane %v430_v16, %v2049_v17 }
  0x41   :  { %1752 = vmatprep.subr.mxu0 %v93_v38  ;;  %v1821_v41 = vpop.eup %1820  ;;  %v91_v42 = vmul.f32 %v1819_v39, %v2027_v7  ;;  %v486_v39 = vld [vmem:[#allocation6 + $0x6] ss:$8 sm:$0xf] }
  0x42   :  { %335 = vrot.lane.b32.xlu1 %v2011_v3, %s1941_s20  ;;  %333 = vrot.lane.b32.xlu0 %v1998_v1, %s1941_s20  ;;  %v90_v43 = vmul.f32 %v1821_v41, %v2032_v8 }
  0x43   :  { %1753 = vmatpush3.msra.mxu0 %v93_v38  ;;  %v443_v38 = vrot.slane %v430_v16, %v2051_v18 }
  0x44   :  { %1754 = vmatprep.subr.mxu0 %v92_v40 }
  0x45   :  { %1755 = vmatpush3.msra.mxu0 %v92_v40 }
  0x46   :  { %231 = vrot.lane.b32.xlu1 %v2045_v13, %s1942_s21  ;;  %229 = vrot.lane.b32.xlu0 %v2003_v2, %s1942_s21 }
  0x47   :  { %1756 = vmatprep.subr.mxu0 %v91_v42 }
  0x48   :  { %1757 = vmatpush3.msra.mxu0 %v91_v42 }
  0x49   :  { %1758 = vmatprep.subr.mxu0 %v90_v43 }
  0x4a   :  { %235 = vrot.lane.b32.xlu1 %v2011_v3, %s1942_s21  ;;  %233 = vrot.lane.b32.xlu0 %v1998_v1, %s1942_s21 }
  0x4b   :  { %1759 = vmatpush3.msra.mxu0 %v90_v43 }
  0x4c   :  { %1761 = vmatmul.mubr.msk.f32.vlgmr.msra.gmra.mxu0 %vm104_vm0, %v2110_v44 }
  0x4d   :  { %792 = vmatprep.mubr.f32.mxu0 %v1945_v45 }
  0x4e   :  { %287 = vrot.lane.b32.xlu1 %v2045_v13, %s1943_s22  ;;  %285 = vrot.lane.b32.xlu0 %v2003_v2, %s1943_s22 }
  0x52   :  { %291 = vrot.lane.b32.xlu1 %v2011_v3, %s1943_s22  ;;  %289 = vrot.lane.b32.xlu0 %v1998_v1, %s1943_s22 }
  0x56   :  { %186 = vrot.lane.b32.xlu1 %v2045_v13, %s1944_s23  ;;  %184 = vrot.lane.b32.xlu0 %v2003_v2, %s1944_s23 }
  0x5a   :  { %190 = vrot.lane.b32.xlu1 %v2011_v3, %s1944_s23  ;;  %188 = vrot.lane.b32.xlu0 %v1998_v1, %s1944_s23 }
  0x5e   :  { %638 = vperm.xlu0 %1791, %v2135_v47  }
  0x90   :  { %v521_v50 = vpop.permute.xlu1 %520  ;;  %v517_v51 = vpop.permute.xlu0 %516 }
  0x94   :  { %v523_v55 = vpop.permute.xlu1 %522  ;;  %v573_v56 = vpop.permute.xlu0 %572 }
  0x95   :  { %v525_v57 = vsel %vm524_vm1, %v521_v50, %v523_v55  ;;  %v528_v58 = vsel %vm524_vm1, %v523_v55, %v517_v51 }
  0x96   :  { %v554_v60 = vmul.f32 %v543_v52, %v525_v57  ;;  %v555_v61 = vmul.f32 %v547_v53, %v528_v58  ;;  %v491_v53 = vrot.slane %v486_v39, %v2035_v10 }
  0x98   :  { %v562_v0 = vrot.slane %v554_v60, 4  ;;  %v563_v1 = vrot.slane %v555_v61, 4  ;;  %v575_v2 = vpop.permute.xlu1 %574  ;;  %v519_v4 = vpop.permute.xlu0 %518 }
  0x99   :  { %v583_v6 = vsel %vm580_vm2, %v573_v56, %v575_v2  ;;  %v526_v7 = vsel %vm524_vm1, %v519_v4, %v521_v50  ;;  %v527_v8 = vsel %vm524_vm1, %v517_v51, %v519_v4  ;;  %v499_v4 = vrot.slane %v486_v39, %v2051_v18 }
  0x9a   :  { %570 = vst [vmem:[#allocation2 + $0x8] sm:$0xf0] %v562_v0  ;;  %571 = vst [vmem:[#allocation2 + $0x78] sm:$0xf0] %v563_v1  ;;  %v608_v11 = vmul.f32 %v591_v59, %v583_v6  ;;  %v552_v12 = vmul.f32 %v535_v62, %v527_v8  ;;  %v553_v14 = vmul.f32 %v539_v63, %v526_v7 }
  0x9b   :  { %v503_v1 = vrot.slane %v486_v39, %v2053_v19 }
  0x9c   :  { %612 = vst [vmem:[#allocation2 + $0x20] sm:$0xf] %v608_v11  ;;  %v560_v20 = vrot.slane %v552_v12, 4  ;;  %v561_v21 = vrot.slane %v553_v14, 4  ;;  %v579_v22 = vpop.permute.xlu1 %578  ;;  %v577_v23 = vpop.permute.xlu0 %576 }
  0x9d   :  { %v584_v25 = vsel %vm580_vm2, %v579_v22, %v573_v56  ;;  %v581_v26 = vsel %vm580_vm2, %v577_v23, %v579_v22  ;;  %v582_v27 = vsel %vm580_vm2, %v575_v2, %v577_v23  ;;  %v495_v2 = vrot.slane %v486_v39, %v2049_v17 }
  0x9e   :  { %568 = vst [vmem:[#allocation2 + $0xf8] sm:$0xf0] %v560_v20  ;;  %569 = vst [vmem:[#allocation2 + $0x38] sm:$0xf0] %v561_v21  ;;  %v611_v28 = vmul.f32 %v603_v5, %v584_v25  ;;  %v609_v29 = vmul.f32 %v595_v9, %v582_v27  ;;  %v610_v30 = vmul.f32 %v599_v15, %v581_v26 }
  0x9f   :  { %v343_v5 = vld [vmem:[#allocation6 + $0x3] ss:$8 sm:$0xf] }
  0xa0   :  { %615 = vst [vmem:[#allocation2 + $0xa0] sm:$0xf] %v611_v28  ;;  %613 = vst [vmem:[#allocation2 + $0xc8] sm:$0xf] %v609_v29  ;;  %v419_v32 = vpop.permute.xlu1 %418  ;;  %v417_v33 = vpop.permute.xlu0 %416  ;;  %v352_v16 = vrot.slane %v343_v5, %v2049_v17  ;;  %v348_v25 = vrot.slane %v343_v5, %v2035_v10  ;;  %v356_v26 = vrot.slane %v343_v5, %v2051_v18 }
  0xa1   :  { %614 = vst [vmem:[#allocation2 + $0x90] sm:$0xf] %v610_v30  ;;  %v427_v34 = vsel %vm424_vm3, %v417_v33, %v419_v32  ;;  %v360_v27 = vrot.slane %v343_v5, %v2053_v19  ;;  %v243_v28 = vld [vmem:[#allocation6 + $0x1] ss:$8 sm:$0xf] }
  0xa2   :  { %v452_v35 = vmul.f32 %v435_v31, %v427_v34 }
  0xa3   :  { %v632_v62 = vld [vmem:[#allocation2 + $0x20] sm:$0xf] }
  0xa4   :  { %v460_v40 = vrot.slane %v452_v35, 4  ;;  %v423_v41 = vpop.permute.xlu1 %422  ;;  %v421_v42 = vpop.permute.xlu0 %420 }
  0xa5   :  { %v428_v43 = vsel %vm424_vm3, %v423_v41, %v417_v33  ;;  %v425_v46 = vsel %vm424_vm3, %v421_v42, %v423_v41  ;;  %v426_v49 = vsel %vm424_vm3, %v419_v32, %v421_v42 }
  0xa6   :  { %468 = vst [vmem:[#allocation2 + $0x80] sm:$0xf0] %v460_v40  ;;  %v455_v50 = vmul.f32 %v447_v36, %v428_v43  ;;  %v453_v51 = vmul.f32 %v439_v37, %v426_v49  ;;  %v454_v52 = vmul.f32 %v443_v38, %v425_v46  ;;  %v252_v38 = vrot.slane %v243_v28, %v2049_v17 }
  0xa7   :  { %v635_v54 = vld [vmem:[#allocation2 + $0xa0] sm:$0xf]  ;;  %v633_v55 = vld [vmem:[#allocation2 + $0xc8] sm:$0xf] }
  0xa8   :  { %v634_v56 = vld [vmem:[#allocation2 + $0x90] sm:$0xf]  ;;  %v463_v57 = vrot.slane %v455_v50, 4  ;;  %v461_v58 = vrot.slane %v453_v51, 4  ;;  %v462_v59 = vrot.slane %v454_v52, 4  ;;  %1727 = vmatprep.subr.msk.mxu0 %vm644_vm4, %v635_v54  ;;  %v475_v60 = vpop.permute.xlu1 %474  ;;  %1724 = vmatprep.subr.msk.mxu1 %vm644_vm4, %v633_v55  ;;  %v473_v61 = vpop.permute.xlu0 %472  ;;  %v248_v55 = vrot.slane %v243_v28, %v2035_v10 }
  0xa9   :  { %v483_v63 = vsel %vm480_vm5, %v473_v61, %v475_v60  ;;  %1725 = vmatpush1.msk.msra.mxu1 %vm644_vm4, %v632_v62  ;;  %1728 = vmatpush1.msk.msra.mxu0 %vm644_vm4, %v634_v56 }
  0xaa   :  { %471 = vst [vmem:[#allocation2 + $0x98] sm:$0xf0] %v463_v57  ;;  %469 = vst [vmem:[#allocation2 + $0x110] sm:$0xf0] %v461_v58  ;;  %v508_v0 = vmul.f32 %v491_v53, %v483_v63 }
  0xab   :  { %470 = vst [vmem:[#allocation2 + $0x118] sm:$0xf0] %v462_v59  ;;  %v256_v59 = vrot.slane %v243_v28, %v2051_v18 }
  0xac   :  { %512 = vst [vmem:[#allocation2 + $0xf8] sm:$0xf] %v508_v0  ;;  %v479_v6 = vpop.permute.xlu1 %478  ;;  %v477_v7 = vpop.permute.xlu0 %476 }
  0xad   :  { %v484_v8 = vsel %vm480_vm5, %v479_v6, %v473_v61  ;;  %v481_v9 = vsel %vm480_vm5, %v477_v7, %v479_v6  ;;  %v482_v11 = vsel %vm480_vm5, %v475_v60, %v477_v7  ;;  %v624_v57 = vld [vmem:[#allocation2 + $0x80] sm:$0xff]  ;;  %v260_v60 = vrot.slane %v243_v28, %v2053_v19 }
  0xae   :  { %v511_v12 = vmul.f32 %v503_v1, %v484_v8  ;;  %v509_v14 = vmul.f32 %v495_v2, %v482_v11  ;;  %v510_v15 = vmul.f32 %v499_v4, %v481_v9  ;;  %v299_v61 = vld [vmem:[#allocation6 + $0x2] ss:$8 sm:$0xf] }
  0xaf   :  { %v308_v8 = vrot.slane %v299_v61, %v2049_v17 }
  0xb0   :  { %515 = vst [vmem:[#allocation2 + $0x78] sm:$0xf] %v511_v12  ;;  %513 = vst [vmem:[#allocation2 + $0x38] sm:$0xf] %v509_v14  ;;  %v332_v20 = vpop.permute.xlu1 %331  ;;  %v330_v21 = vpop.permute.xlu0 %329 }
  0xb1   :  { %514 = vst [vmem:[#allocation2 + $0x8] sm:$0xf] %v510_v15  ;;  %v340_v22 = vsel %vm337_vm6, %v330_v21, %v332_v20  ;;  %v625_v53 = vld [vmem:[#allocation2 + $0x110] sm:$0xff]  ;;  %v627_v54 = vld [vmem:[#allocation2 + $0x98] sm:$0xff] }
  0xb2   :  { %v366_v23 = vmul.f32 %v352_v16, %v340_v22  ;;  %v626_v58 = vld [vmem:[#allocation2 + $0x118] sm:$0xff]  ;;  %v312_v22 = vrot.slane %v299_v61, %v2051_v18 }
  0xb3   :  { %v628_v51 = vld [vmem:[#allocation2 + $0xf8] sm:$0xff] }
  0xb4   :  { %v374_v29 = vrot.slane %v366_v23, 4  ;;  %v336_v30 = vpop.permute.xlu1 %335  ;;  %v334_v31 = vpop.permute.xlu0 %333  ;;  %v316_v23 = vrot.slane %v299_v61, %v2053_v19 }
  0xb5   :  { %v341_v32 = vsel %vm337_vm6, %v336_v30, %v330_v21  ;;  %v338_v33 = vsel %vm337_vm6, %v334_v31, %v336_v30  ;;  %v339_v34 = vsel %vm337_vm6, %v332_v20, %v334_v31  ;;  %v304_v21 = vrot.slane %v299_v61, %v2035_v10 }
  0xb6   :  { %382 = vst [vmem:[#allocation2 + $0x68] sm:$0xf0] %v374_v29  ;;  %v365_v35 = vmul.f32 %v348_v25, %v341_v32  ;;  %v367_v36 = vmul.f32 %v356_v26, %v339_v34  ;;  %v368_v37 = vmul.f32 %v360_v27, %v338_v33  ;;  %v199_v25 = vld [vmem:[#allocation6] ss:$8 sm:$0xf] }
  0xb7   :  { %v629_v39 = vld [vmem:[#allocation2 + $0x38] sm:$0xff]  ;;  %v208_v34 = vrot.slane %v199_v25, %v2049_v17 }
  0xb8   :  { %v631_v40 = vld [vmem:[#allocation2 + $0x78] sm:$0xff]  ;;  %v630_v41 = vld [vmem:[#allocation2 + $0x8] sm:$0xff]  ;;  %v373_v42 = vrot.slane %v365_v35, 4  ;;  %v375_v43 = vrot.slane %v367_v36, 4  ;;  %v376_v46 = vrot.slane %v368_v37, 4  ;;  %v232_v49 = vpop.permute.xlu1 %231  ;;  %681 = vmatprep.subr.mxu1 %v629_v39  ;;  %v230_v50 = vpop.permute.xlu0 %229  ;;  %v204_v39 = vrot.slane %v199_v25, %v2035_v10 }
  0xb9   :  { %752 = vmatprep.subr.mxu0 %v631_v40  ;;  %v240_v52 = vsel %vm237_vm7, %v230_v50, %v232_v49  ;;  %682 = vmatpush1.msra.mxu1 %v628_v51  ;;  %v212_v40 = vrot.slane %v199_v25, %v2051_v18 }
  0xba   :  { %753 = vmatpush1.msra.mxu0 %v630_v41  ;;  %381 = vst [vmem:[#allocation2 + $0x108] sm:$0xf0] %v373_v42  ;;  %383 = vst [vmem:[#allocation2 + $0x30] sm:$0xf0] %v375_v43  ;;  %v266_v56 = vmul.f32 %v252_v38, %v240_v52  ;;  %683 = vmatprep.subr.mxu1 %v625_v53  ;;  %v216_v41 = vrot.slane %v199_v25, %v2053_v19 }
  0xbb   :  { %384 = vst [vmem:[#allocation2 + $0x18] sm:$0xf0] %v376_v46  ;;  %754 = vmatprep.subr.mxu0 %v627_v54  ;;  %684 = vmatpush1.msra.mxu1 %v624_v57 }
  0xbc   :  { %755 = vmatpush1.msra.mxu0 %v626_v58  ;;  %v274_v62 = vrot.slane %v266_v56, 4  ;;  %v236_v63 = vpop.permute.xlu1 %235  ;;  %v234_v0 = vpop.permute.xlu0 %233 }
  0xbd   :  { %v241_v1 = vsel %vm237_vm7, %v236_v63, %v230_v50  ;;  %v238_v2 = vsel %vm237_vm7, %v234_v0, %v236_v63  ;;  %v239_v4 = vsel %vm237_vm7, %v232_v49, %v234_v0 }
  0xbe   :  { %282 = vst [vmem:[#allocation2 + $0xd0] sm:$0xf0] %v274_v62  ;;  %v265_v5 = vmul.f32 %v248_v55, %v241_v1  ;;  %v267_v6 = vmul.f32 %v256_v59, %v239_v4  ;;  %v268_v7 = vmul.f32 %v260_v60, %v238_v2  ;;  %v1947_v62 = vmov 32  }
  0xbf   :  { %1792 = vset.pattern.permute.xlu1 %v1947_v62  ;;  %1793 = vset.pattern.permute.xlu0 %v1947_v62 }
  0xc0   :  { %v273_v9 = vrot.slane %v265_v5, 4  ;;  %v275_v11 = vrot.slane %v267_v6, 4  ;;  %v276_v12 = vrot.slane %v268_v7, 4  ;;  %v288_v14 = vpop.permute.xlu1 %287  ;;  %v286_v15 = vpop.permute.xlu0 %285 }
  0xc1   :  { %v296_v16 = vsel %vm293_vm8, %v286_v15, %v288_v14 }
  0xc2   :  { %281 = vst [vmem:[#allocation2 + $0xb0] sm:$0xf0] %v273_v9  ;;  %283 = vst [vmem:[#allocation2 + $0x10] sm:$0xf0] %v275_v11  ;;  %v322_v20 = vmul.f32 %v308_v8, %v296_v16  ;;  %v1949_v16 = vmov 42  }
  0xc3   :  { %284 = vst [vmem:[#allocation2 + $0x48] sm:$0xf0] %v276_v12 }
  0xc4   :  { %326 = vst [vmem:[#allocation2 + $0x68] sm:$0xf] %v322_v20  ;;  %v292_v26 = vpop.permute.xlu1 %291  ;;  %v290_v27 = vpop.permute.xlu0 %289  ;;  %v1950_v20 = vmov 1  }
  0xc5   :  { %v297_v28 = vsel %vm293_vm8, %v292_v26, %v286_v15  ;;  %v294_v29 = vsel %vm293_vm8, %v290_v27, %v292_v26  ;;  %v295_v30 = vsel %vm293_vm8, %v288_v14, %v290_v27  ;;  %v1948_v15 = vmov 41  }
  0xc6   :  { %v321_v31 = vmul.f32 %v304_v21, %v297_v28  ;;  %v323_v32 = vmul.f32 %v312_v22, %v295_v30  ;;  %v324_v33 = vmul.f32 %v316_v23, %v294_v29  ;;  %v1951_v21 = vmov 0  }
  0xc8   :  { %325 = vst [vmem:[#allocation2 + $0x108] sm:$0xf] %v321_v31  ;;  %327 = vst [vmem:[#allocation2 + $0x30] sm:$0xf] %v323_v32  ;;  %v187_v35 = vpop.permute.xlu1 %186  ;;  %v185_v36 = vpop.permute.xlu0 %184 }
  0xc9   :  { %328 = vst [vmem:[#allocation2 + $0x18] sm:$0xf] %v324_v33  ;;  %v197_v37 = vsel %vm194_vm9, %v185_v36, %v187_v35 }
  0xca   :  { %v222_v38 = vmul.f32 %v208_v34, %v197_v37 }
  0xcb   :  { %v621_v42 = vld [vmem:[#allocation2 + $0x68] sm:$0xff] }
  0xcc   :  { %226 = vst [vmem:[#allocation2 + $0xd0] sm:$0xf] %v222_v38  ;;  %v191_v43 = vpop.permute.xlu1 %190  ;;  %v189_v46 = vpop.permute.xlu0 %188  ;;  %685 = vmatprep.subr.mxu1 %v621_v42 }
  0xcd   :  { %v198_v49 = vsel %vm194_vm9, %v191_v43, %v185_v36  ;;  %v195_v50 = vsel %vm194_vm9, %v189_v46, %v191_v43  ;;  %v196_v51 = vsel %vm194_vm9, %v187_v35, %v189_v46 }
  0xce   :  { %v221_v52 = vmul.f32 %v204_v39, %v198_v49  ;;  %v223_v53 = vmul.f32 %v212_v40, %v196_v51  ;;  %v224_v54 = vmul.f32 %v216_v41, %v195_v50 }
  0xcf   :  { %v620_v55 = vld [vmem:[#allocation2 + $0x108] sm:$0xff]  ;;  %v622_v57 = vld [vmem:[#allocation2 + $0x30] sm:$0xff] }
  0xd0   :  { %v623_v56 = vld [vmem:[#allocation2 + $0x18] sm:$0xff]  ;;  %225 = vst [vmem:[#allocation2 + $0xb0] sm:$0xf] %v221_v52  ;;  %227 = vst [vmem:[#allocation2 + $0x10] sm:$0xf] %v223_v53  ;;  %686 = vmatpush1.msra.mxu1 %v620_v55 }
  0xd1   :  { %228 = vst [vmem:[#allocation2 + $0x48] sm:$0xf] %v224_v54  ;;  %756 = vmatprep.subr.mxu0 %v623_v56 }
  0xd2   :  { %757 = vmatpush1.msra.mxu0 %v622_v57 }
  0xd3   :  { %v617_v58 = vld [vmem:[#allocation2 + $0xd0] sm:$0xff] }
  0xd4   :  { %687 = vmatprep.subr.mxu1 %v617_v58 }
  0xd7   :  { %v616_v59 = vld [vmem:[#allocation2 + $0xb0] sm:$0xff] }
  0xd8   :  { %v619_v60 = vld [vmem:[#allocation2 + $0x48] sm:$0xff]  ;;  %v618_v61 = vld [vmem:[#allocation2 + $0x10] sm:$0xff]  ;;  %688 = vmatpush1.msra.mxu1 %v616_v59 }
  0xd9   :  { %758 = vmatprep.subr.mxu0 %v619_v60  ;;  %1726 = vmatmul.mubr.msk.f32.vlgmr.msra.gmra.mxu1 %vm641_vm10, %v2135_v47  ;;  %v639_v1 = vpop.permute.xlu0 %638 }
  0xda   :  { %759 = vmatpush1.msra.mxu0 %v618_v61  ;;  %1377 = vmatprep.mubr.f32.mxu1 %v1945_v45 }
  0xdb   :  { %1729 = vmatmul.mubr.msk.f32.vlgmr.msra.gmra.mxu0 %vm641_vm10, %v2135_v47 }
  0xdc   :  { %1448 = vmatprep.mubr.f32.mxu0 %v1945_v45 }
 0x10c   :  { %v1762_v63 = vpop.f32.mrf.mxu0 }
 0x10e   :  { %v175_v0 = vpop.f32.mrf.mxu0 }
 0x199   :  { %v723_v2 = vpop.f32.mrf.mxu1 }
 0x19a   :  { %v724_v7 = vadd.f32 %v723_v2, %v639_v1 }
 0x19b   :  { %v794_v4 = vpop.f32.mrf.mxu0  ;;  %v725_v6 = vpop.f32.mrf.mxu1 }
 0x19c   :  { %v795_v5 = vadd.f32 %v794_v4, %v639_v1  ;;  %v726_v8 = vadd.f32 %v725_v6, %v639_v1 }
 0x19d   :  { %v796_v9 = vpop.f32.mrf.mxu0 }
 0x19e   :  { %v797_v11 = vadd.f32 %v796_v9, %v639_v1  ;;  %v799_v12 = vadd.f32 %v726_v8, %v724_v7 }
 0x1a0   :  { %v857_v14 = vadd.f32 %v797_v11, %v795_v5  ;;  %800 = vadd.xlane.f32.xlu1 %v799_v12 }
 0x1a2   :  { %858 = vadd.xlane.f32.xlu0 %v857_v14 }
 0x1b1   :  { %96 = vperm.xlu1 %1792, %v2063_v24  }
 0x1b5   :  { %1794 = vset.pattern.permute.xlu1 %v1948_v15 }
 0x1b6   :  { %817 = vperm.xlu1 %1794, %v2135_v47  }
 0x1b8   :  { %101 = vperm.xlu0 %1793, %v2110_v44  }
 0x1ba   :  { %1795 = vset.pattern.permute.xlu1 %v1949_v16 }
 0x1bb   :  { %823 = vperm.xlu1 %1795, %v2135_v47  }
 0x1bc   :  { %1797 = vset.pattern.permute.xlu0 %v1950_v20 }
 0x1bf   :  { %1796 = vset.pattern.permute.xlu1 %v1951_v21 }
 0x229   :  { %v801_v22 = vpop.xlane.xlu1 %800 }
 0x22a   :  { %v803_v44 = vmul.f32 0.00390625, %v801_v22 }
 0x22b   :  { %v859_v23 = vpop.xlane.xlu0 %858 }
 0x22c   :  { %v860_v25 = vmul.f32 0.00390625, %v859_v23  ;;  %v804_v33 = vsub.f32 %v724_v7, %v803_v44  ;;  %v805_v34 = vsub.f32 %v726_v8, %v803_v44 }
 0x22d   :  { %v97_v24 = vpop.permute.xlu1 %96 }
 0x22e   :  { %v861_v26 = vsub.f32 %v795_v5, %v860_v25  ;;  %v862_v27 = vsub.f32 %v797_v11, %v860_v25  ;;  %v176_v28 = vadd.f32 %v175_v0, %v97_v24  ;;  %v806_v35 = vmul.f32 %v804_v33, %v804_v33 }
 0x22f   :  { %v807_v36 = vmul.f32 %v805_v34, %v805_v34 }
 0x230   :  { %v863_v29 = vmul.f32 %v861_v26, %v861_v26  ;;  %v864_v30 = vmul.f32 %v862_v27, %v862_v27  ;;  %v828_v31 = vadd.f32 1.0, %v176_v28  ;;  %v1071_v28 = vld [vmem:[#allocation6 + $0x4] ss:$8 sm:$0xf] }
 0x231   :  { %v808_v37 = vadd.f32 %v807_v36, %v806_v35  ;;  %v818_v43 = vpop.permute.xlu1 %817 }
 0x232   :  { %v865_v32 = vadd.f32 %v864_v30, %v863_v29  ;;  %831 = vperm.xlu1 %1796, %v828_v31   ;;  %v1084_v29 = vrot.slane %v1071_v28, %v2051_v18 }
 0x233   :  { %v102_v38 = vpop.permute.xlu0 %101 }
 0x234   :  { %866 = vadd.xlane.f32.xlu0 %v865_v32  ;;  %v181_v39 = vadd.f32 %v1762_v63, %v102_v38 }
 0x236   :  { %v824_v46 = vpop.permute.xlu1 %823 }
 0x24a   :  { %878 = vperm.xlu0 %1797, %v828_v31   ;;  %v1088_v31 = vrot.slane %v1071_v28, %v2053_v19 }
 0x256   :  { %809 = vadd.xlane.f32.xlu1 %v808_v37 }
 0x267   :  { %838 = vperm.xlu1 %1796, %v181_v39  }
 0x26b   :  { %1798 = vset.pattern.permute.xlu1 %v1950_v20 }
 0x26c   :  { %884 = vperm.xlu1 %1798, %v181_v39  }
 0x2ad   :  { %v832_v52 = vpop.permute.xlu1 %831 }
 0x2bd   :  { %v867_v40 = vpop.xlane.xlu0 %866 }
 0x2be   :  { %v868_v41 = vmul.f32 0.00390625, %v867_v40  ;;  %v1076_v40 = vrot.slane %v1071_v28, %v2035_v10 }
 0x2c0   :  { %v869_v42 = vadd.f32 1e-05, %v868_v41 }
 0x2c2   :  { %1822 = vrsqrt.f32 %v869_v42  ;;  %v1080_v42 = vrot.slane %v1071_v28, %v2049_v17 }
 0x2c5   :  { %v879_v61 = vpop.permute.xlu0 %878 }
 0x2cf   :  { %v1823_v49 = vpop.eup %1822 }
 0x2d0   :  { %v871_v50 = vmul.f32 %v1823_v49, %v861_v26  ;;  %v872_v51 = vmul.f32 %v1823_v49, %v862_v27 }
 0x2d2   :  { %v873_v53 = vmul.f32 %v871_v50, %v818_v43  ;;  %v874_v54 = vmul.f32 %v872_v51, %v818_v43 }
 0x2d4   :  { %v875_v57 = vadd.f32 %v873_v53, %v824_v46  ;;  %v876_v58 = vadd.f32 %v874_v54, %v824_v46  ;;  %v1239_v53 = vld [vmem:[#allocation6 + $0x20] ss:$8 sm:$0xf] }
 0x2d6   :  { %v881_v62 = vmul.f32 %v879_v61, %v875_v57  ;;  %v882_v63 = vmul.f32 %v879_v61, %v876_v58 }
 0x2df   :  { %v810_v55 = vpop.xlane.xlu1 %809 }
 0x2e0   :  { %v811_v56 = vmul.f32 0.00390625, %v810_v55  ;;  %v1244_v55 = vrot.slane %v1239_v53, %v2035_v10 }
 0x2e2   :  { %v812_v59 = vadd.f32 1e-05, %v811_v56 }
 0x2e3   :  { %v839_v60 = vpop.permute.xlu1 %838 }
 0x2e4   :  { %1824 = vrsqrt.f32 %v812_v59 }
 0x2e7   :  { %v885_v0 = vpop.permute.xlu1 %884 }
 0x2e8   :  { %v887_v1 = vadd.f32 %v885_v0, %v881_v62  ;;  %v888_v2 = vadd.f32 %v885_v0, %v882_v63  ;;  %v1252_v0 = vrot.slane %v1239_v53, %v2051_v18 }
 0x2ea   :  { %v1732_v4 = vmul.f32 -1.442695, %v887_v1  ;;  %v1733_v5 = vmul.f32 -1.442695, %v888_v2 }
 0x2ec   :  { %1826 = vpow2.f32 %v1732_v4 }
 0x2ed   :  { %1828 = vpow2.f32 %v1733_v5 }
 0x2f1   :  { %v1825_v6 = vpop.eup %1824 }
 0x2f2   :  { %v814_v7 = vmul.f32 %v1825_v6, %v804_v33  ;;  %v815_v8 = vmul.f32 %v1825_v6, %v805_v34 }
 0x2f4   :  { %v820_v9 = vmul.f32 %v818_v43, %v814_v7  ;;  %v821_v11 = vmul.f32 %v818_v43, %v815_v8  ;;  %v1197_v8 = vld [vmem:[#allocation6 + $0x7] ss:$8 sm:$0xf] }
 0x2f6   :  { %v826_v12 = vadd.f32 %v824_v46, %v820_v9  ;;  %v827_v14 = vadd.f32 %v824_v46, %v821_v11 }
 0x2f8   :  { %v834_v15 = vmul.f32 %v832_v52, %v826_v12  ;;  %v835_v16 = vmul.f32 %v832_v52, %v827_v14  ;;  %v1952_v52 = vmov 43   ;;  %v1202_v12 = vrot.slane %v1197_v8, %v2035_v10 }
 0x2f9   :  { %v1827_v20 = vpop.eup %1826  ;;  %1799 = vset.pattern.permute.xlu1 %v1952_v52 }
 0x2fa   :  { %v1829_v21 = vpop.eup %1828  ;;  %v841_v22 = vadd.f32 %v839_v60, %v834_v15  ;;  %v842_v23 = vadd.f32 %v839_v60, %v835_v16  ;;  %v895_v25 = vadd.f32 1.0, %v1827_v20  ;;  %v1248_v60 = vrot.slane %v1239_v53, %v2049_v17 }
 0x2fb   :  { %v896_v26 = vadd.f32 1.0, %v1829_v21  ;;  %v1206_v20 = vrot.slane %v1197_v8, %v2049_v17 }
 0x2fc   :  { %v1730_v27 = vmul.f32 -1.442695, %v841_v22  ;;  %v1731_v24 = vmul.f32 -1.442695, %v842_v23  ;;  %1830 = vrcp.f32 %v895_v25 }
 0x2fd   :  { %1832 = vrcp.f32 %v896_v26  ;;  %v1210_v26 = vrot.slane %v1197_v8, %v2051_v18 }
 0x2fe   :  { %1834 = vpow2.f32 %v1730_v27  ;;  %v1214_v27 = vrot.slane %v1197_v8, %v2053_v19 }
 0x2ff   :  { %1836 = vpow2.f32 %v1731_v24  ;;  %v1155_v24 = vld [vmem:[#allocation6 + $0x6] ss:$8 sm:$0xf] }
 0x309   :  { %v1831_v30 = vpop.eup %1830 }
 0x30a   :  { %v1833_v32 = vpop.eup %1832  ;;  %v901_v44 = vmul.f32 %v1831_v30, %v887_v1 }
 0x30b   :  { %v1835_v33 = vpop.eup %1834  ;;  %v902_v34 = vmul.f32 %v1833_v32, %v888_v2 }
 0x30c   :  { %v1837_v35 = vpop.eup %1836  ;;  %v849_v36 = vadd.f32 1.0, %v1835_v33  ;;  %v2259_v37 = vmul.f32 %v1084_v29, %v901_v44  ;;  %v1160_v33 = vrot.slane %v1155_v24, %v2035_v10 }
 0x30d   :  { %v850_v38 = vadd.f32 1.0, %v1837_v35  ;;  %v2261_v39 = vmul.f32 %v1088_v31, %v902_v34 }
 0x30e   :  { %1838 = vrcp.f32 %v849_v36  ;;  %1099 = vst [vmem:[#allocation2 + $0x90] sm:$0xff] %v2259_v37 }
 0x30f   :  { %1840 = vrcp.f32 %v850_v38  ;;  %1100 = vst [vmem:[#allocation2 + $0xa0] sm:$0xff] %v2261_v39 }
 0x31b   :  { %v1839_v41 = vpop.eup %1838 }
 0x31c   :  { %v1841_v43 = vpop.eup %1840  ;;  %v855_v46 = vmul.f32 %v1839_v41, %v841_v22 }
 0x31d   :  { %v856_v49 = vmul.f32 %v1841_v43, %v842_v23  ;;  %v1168_v43 = vrot.slane %v1155_v24, %v2051_v18 }
 0x31e   :  { %1227 = vrot.lane.b32.xlu1 %v855_v46, %s1938_s18  ;;  %v2268_v50 = vmul.f32 %v1076_v40, %v855_v46 }
 0x31f   :  { %1145 = vrot.lane.b32.xlu0 %v856_v49, %s1940_s19  ;;  %v2271_v51 = vmul.f32 %v1080_v42, %v856_v49  ;;  %v1164_v42 = vrot.slane %v1155_v24, %v2049_v17 }
 0x320   :  { %1097 = vst [vmem:[#allocation2 + $0x20] sm:$0xff] %v2268_v50 }
 0x321   :  { %1098 = vst [vmem:[#allocation2 + $0xc8] sm:$0xff] %v2271_v51 }
 0x322   :  { %1229 = vrot.lane.b32.xlu1 %v856_v49, %s1938_s18 }
 0x323   :  { %1149 = vrot.lane.b32.xlu0 %v902_v34, %s1940_s19 }
 0x326   :  { %1231 = vrot.lane.b32.xlu1 %v901_v44, %s1938_s18 }
 0x327   :  { %1103 = vrot.lane.b32.xlu0 %v856_v49, %s1939_s1 }
 0x32a   :  { %1233 = vrot.lane.b32.xlu1 %v902_v34, %s1938_s18 }
 0x32b   :  { %1107 = vrot.lane.b32.xlu0 %v902_v34, %s1939_s1 }
 0x32e   :  { %1185 = vrot.lane.b32.xlu1 %v855_v46, %s1937_s10 }
 0x32f   :  { %1031 = vrot.lane.b32.xlu0 %v856_v49, %s1941_s20 }
 0x332   :  { %1187 = vrot.lane.b32.xlu1 %v856_v49, %s1937_s10 }
 0x333   :  { %1035 = vrot.lane.b32.xlu0 %v902_v34, %s1941_s20 }
 0x336   :  { %1189 = vrot.lane.b32.xlu1 %v901_v44, %s1937_s10 }
 0x337   :  { %989 = vrot.lane.b32.xlu0 %v856_v49, %s1943_s22 }
 0x33a   :  { %1191 = vrot.lane.b32.xlu1 %v902_v34, %s1937_s10 }
 0x33b   :  { %993 = vrot.lane.b32.xlu0 %v902_v34, %s1943_s22 }
 0x33e   :  { %1143 = vrot.lane.b32.xlu1 %v855_v46, %s1940_s19 }
 0x33f   :  { %947 = vrot.lane.b32.xlu0 %v856_v49, %s1942_s21 }
 0x342   :  { %1147 = vrot.lane.b32.xlu1 %v901_v44, %s1940_s19 }
 0x343   :  { %951 = vrot.lane.b32.xlu0 %v902_v34, %s1942_s21 }
 0x346   :  { %1101 = vrot.lane.b32.xlu1 %v855_v46, %s1939_s1 }
 0x347   :  { %905 = vrot.lane.b32.xlu0 %v856_v49, %s1944_s23 }
 0x34a   :  { %1105 = vrot.lane.b32.xlu1 %v901_v44, %s1939_s1 }
 0x34b   :  { %909 = vrot.lane.b32.xlu0 %v902_v34, %s1944_s23  ;;  %v1172_v34 = vrot.slane %v1155_v24, %v2053_v19 }
 0x34e   :  { %1029 = vrot.lane.b32.xlu1 %v855_v46, %s1941_s20 }
 0x34f   :  { %1535 = vrot.lane.b32.xlu0 %v2135_v47, %s1953_s26 }
 0x352   :  { %1033 = vrot.lane.b32.xlu1 %v901_v44, %s1941_s20 }
 0x356   :  { %987 = vrot.lane.b32.xlu1 %v855_v46, %s1943_s22 }
 0x35a   :  { %991 = vrot.lane.b32.xlu1 %v901_v44, %s1943_s22 }
 0x35e   :  { %945 = vrot.lane.b32.xlu1 %v855_v46, %s1942_s21 }
 0x362   :  { %949 = vrot.lane.b32.xlu1 %v901_v44, %s1942_s21 }
 0x366   :  { %903 = vrot.lane.b32.xlu1 %v855_v46, %s1944_s23  ;;  %v1113_v46 = vld [vmem:[#allocation6 + $0x5] ss:$8 sm:$0xf] }
 0x36a   :  { %907 = vrot.lane.b32.xlu1 %v901_v44, %s1944_s23 }
 0x36e   :  { %1306 = vperm.xlu1 %1799, %v2135_v47   ;;  %v1256_v47 = vrot.slane %v1239_v53, %v2053_v19 }
 0x390   :  { %v1228_v54 = vpop.permute.xlu1 %1227 }
 0x391   :  { %v1146_v58 = vpop.permute.xlu0 %1145 }
 0x394   :  { %v1230_v56 = vpop.permute.xlu1 %1229 }
 0x395   :  { %v1237_v57 = vsel %vm580_vm2, %v1228_v54, %v1230_v56  ;;  %v1150_v1 = vpop.permute.xlu0 %1149 }
 0x396   :  { %v1261_v59 = vmul.f32 %v1244_v55, %v1237_v57  ;;  %v1118_v57 = vrot.slane %v1113_v46, %v2035_v10 }
 0x398   :  { %v1232_v61 = vpop.permute.xlu1 %1231 }
 0x399   :  { %v1236_v62 = vsel %vm580_vm2, %v1230_v56, %v1232_v61  ;;  %v1104_v11 = vpop.permute.xlu0 %1103 }
 0x39a   :  { %v1262_v63 = vmul.f32 %v1248_v60, %v1236_v62 }
 0x39c   :  { %v1234_v2 = vpop.permute.xlu1 %1233  ;;  %1327 = vmatprep.subr.mxu1 %v1262_v63 }
 0x39d   :  { %v1235_v4 = vsel %vm580_vm2, %v1232_v61, %v1234_v2  ;;  %v1238_v5 = vsel %vm580_vm2, %v1234_v2, %v1228_v54  ;;  %1328 = vmatpush1.msra.mxu1 %v1261_v59  ;;  %v1108_v21 = vpop.permute.xlu0 %1107  ;;  %v1130_v59 = vrot.slane %v1113_v46, %v2053_v19  ;;  %v1041_v2 = vld [vmem:[#allocation6 + $0x3] ss:$8 sm:$0xf] }
 0x39e   :  { %v1263_v6 = vmul.f32 %v1252_v0, %v1235_v4  ;;  %v1264_v7 = vmul.f32 %v1256_v47, %v1238_v5 }
 0x3a0   :  { %v1186_v9 = vpop.permute.xlu1 %1185  ;;  %1398 = vmatprep.subr.mxu0 %v1264_v7 }
 0x3a1   :  { %1399 = vmatpush1.msra.mxu0 %v1263_v6  ;;  %v2331_v31 = vpop.permute.xlu0 %1031 }
 0x3a4   :  { %v1188_v14 = vpop.permute.xlu1 %1187 }
 0x3a5   :  { %v1195_v15 = vsel %vm524_vm1, %v1186_v9, %v1188_v14  ;;  %v1036_v49 = vpop.permute.xlu0 %1035 }
 0x3a6   :  { %v1219_v16 = vmul.f32 %v1202_v12, %v1195_v15  ;;  %v1050_v12 = vrot.slane %v1041_v2, %v2049_v17 }
 0x3a8   :  { %v1190_v22 = vpop.permute.xlu1 %1189 }
 0x3a9   :  { %v1194_v23 = vsel %vm524_vm1, %v1188_v14, %v1190_v22  ;;  %v990_v63 = vpop.permute.xlu0 %989 }
 0x3aa   :  { %v1220_v25 = vmul.f32 %v1206_v20, %v1194_v23  ;;  %v1058_v23 = vrot.slane %v1041_v2, %v2053_v19 }
 0x3ac   :  { %v1192_v28 = vpop.permute.xlu1 %1191  ;;  %1329 = vmatprep.subr.mxu1 %v1220_v25  ;;  %v999_v25 = vld [vmem:[#allocation6 + $0x2] ss:$8 sm:$0xf] }
 0x3ad   :  { %v1193_v29 = vsel %vm524_vm1, %v1190_v22, %v1192_v28  ;;  %v1196_v30 = vsel %vm524_vm1, %v1192_v28, %v1186_v9  ;;  %1330 = vmatpush1.msra.mxu1 %v1219_v16  ;;  %v1046_v9 = vrot.slane %v1041_v2, %v2035_v10  ;;  %v994_v14 = vpop.permute.xlu0 %993 }
 0x3ae   :  { %v1221_v32 = vmul.f32 %v1210_v26, %v1193_v29  ;;  %v1222_v44 = vmul.f32 %v1214_v27, %v1196_v30  ;;  %v1008_v29 = vrot.slane %v999_v25, %v2049_v17 }
 0x3b0   :  { %v1144_v35 = vpop.permute.xlu1 %1143  ;;  %1400 = vmatprep.subr.mxu0 %v1222_v44 }
 0x3b1   :  { %v1153_v36 = vsel %vm480_vm5, %v1144_v35, %v1146_v58  ;;  %v1154_v38 = vsel %vm480_vm5, %v1150_v1, %v1144_v35  ;;  %1401 = vmatpush1.msra.mxu0 %v1221_v32  ;;  %v948_v24 = vpop.permute.xlu0 %947  ;;  %v957_v35 = vld [vmem:[#allocation6 + $0x1] ss:$8 sm:$0xf] }
 0x3b2   :  { %v1177_v40 = vmul.f32 %v1160_v33, %v1153_v36  ;;  %v1180_v41 = vmul.f32 %v1172_v34, %v1154_v38  ;;  %v1012_v33 = vrot.slane %v999_v25, %v2051_v18  ;;  %v1016_v34 = vrot.slane %v999_v25, %v2053_v19 }
 0x3b4   :  { %v1148_v52 = vpop.permute.xlu1 %1147  ;;  %1402 = vmatprep.subr.mxu0 %v1180_v41 }
 0x3b5   :  { %v1151_v53 = vsel %vm480_vm5, %v1148_v52, %v1150_v1  ;;  %v1152_v54 = vsel %vm480_vm5, %v1146_v58, %v1148_v52  ;;  %v1122_v58 = vrot.slane %v1113_v46, %v2049_v17  ;;  %v1126_v1 = vrot.slane %v1113_v46, %v2051_v18  ;;  %v952_v36 = vpop.permute.xlu0 %951 }
 0x3b6   :  { %v1178_v55 = vmul.f32 %v1164_v42, %v1152_v54  ;;  %v1179_v56 = vmul.f32 %v1168_v43, %v1151_v53  ;;  %v962_v46 = vrot.slane %v957_v35, %v2035_v10 }
 0x3b8   :  { %v1102_v60 = vpop.permute.xlu1 %1101  ;;  %1331 = vmatprep.subr.mxu1 %v1178_v55  ;;  %1403 = vmatpush1.msra.mxu0 %v1179_v56 }
 0x3b9   :  { %v1111_v61 = vsel %vm424_vm3, %v1102_v60, %v1104_v11  ;;  %v1112_v62 = vsel %vm424_vm3, %v1108_v21, %v1102_v60  ;;  %1332 = vmatpush1.msra.mxu1 %v1177_v40  ;;  %v906_v55 = vpop.permute.xlu0 %905  ;;  %v974_v60 = vrot.slane %v957_v35, %v2053_v19 }
 0x3ba   :  { %v1135_v0 = vmul.f32 %v1118_v57, %v1111_v61  ;;  %v1138_v47 = vmul.f32 %v1130_v59, %v1112_v62  ;;  %v970_v59 = vrot.slane %v957_v35, %v2051_v18  ;;  %v915_v61 = vld [vmem:[#allocation6] ss:$8 sm:$0xf] }
 0x3bc   :  { %v1106_v4 = vpop.permute.xlu1 %1105  ;;  %1404 = vmatprep.subr.mxu0 %v1138_v47 }
 0x3bd   :  { %v1109_v5 = vsel %vm424_vm3, %v1106_v4, %v1108_v21  ;;  %v1110_v6 = vsel %vm424_vm3, %v1104_v11, %v1106_v4  ;;  %v1054_v21 = vrot.slane %v1041_v2, %v2051_v18  ;;  %v924_v2 = vrot.slane %v915_v61, %v2049_v17  ;;  %v910_v4 = vpop.permute.xlu0 %909 }
 0x3be   :  { %v1136_v7 = vmul.f32 %v1122_v58, %v1110_v6  ;;  %v1137_v8 = vmul.f32 %v1126_v1, %v1109_v5  ;;  %v920_v1 = vrot.slane %v915_v61, %v2035_v10 }
 0x3c0   :  { %v1030_v15 = vpop.permute.xlu1 %1029  ;;  %1333 = vmatprep.subr.mxu1 %v1136_v7  ;;  %1405 = vmatpush1.msra.mxu0 %v1137_v8 }
 0x3c1   :  { %v1039_v16 = vsel %vm337_vm6, %v1030_v15, %v2331_v31  ;;  %v1040_v20 = vsel %vm337_vm6, %v1036_v49, %v1030_v15  ;;  %1334 = vmatpush1.msra.mxu1 %v1135_v0  ;;  %1406 = vmatprep.subr.mxu0 %v2261_v39  ;;  %v1536_v48 = vpop.permute.xlu0 %1535 }
 0x3c2   :  { %v1063_v11 = vmul.f32 %v1046_v9, %v1040_v20  ;;  %v1064_v22 = vmul.f32 %v1050_v12, %v1039_v16  ;;  %1335 = vmatprep.subr.mxu1 %v2271_v51  ;;  %1407 = vmatpush1.msra.mxu0 %v2259_v37  ;;  %v1004_v37 = vrot.slane %v999_v25, %v2035_v10 }
 0x3c3   :  { %1336 = vmatpush1.msra.mxu1 %v2268_v50  ;;  %v928_v12 = vrot.slane %v915_v61, %v2051_v18  ;;  %v932_v10 = vrot.slane %v915_v61, %v2053_v19  ;;  %v1862_v19 = vld [vmem:[%s2437_s0] sm:$0xff] }
 0x3c4   :  { %1067 = vst [vmem:[#allocation2 + $0xf8] sm:$0xff] %v1063_v11  ;;  %1068 = vst [vmem:[#allocation2 + $0x38] sm:$0xff] %v1064_v22  ;;  %v1034_v26 = vpop.permute.xlu1 %1033  ;;  %1337 = vmatprep.subr.mxu1 %v1064_v22 }
 0x3c5   :  { %v1037_v27 = vsel %vm337_vm6, %v1034_v26, %v1036_v49  ;;  %v1038_v39 = vsel %vm337_vm6, %v2331_v31, %v1034_v26  ;;  %1338 = vmatpush1.msra.mxu1 %v1063_v11  ;;  %v966_v49 = vrot.slane %v957_v35, %v2049_v17  ;;  %v50_v17 = vld [vmem:[%s2439_s2 + $0x8] sm:$0xff] }
 0x3c6   :  { %v1065_v28 = vmul.f32 %v1054_v21, %v1038_v39  ;;  %v1066_v51 = vmul.f32 %v1058_v23, %v1037_v27 }
 0x3c8   :  { %1069 = vst [vmem:[#allocation2 + $0x8] sm:$0xff] %v1065_v28  ;;  %1070 = vst [vmem:[#allocation2 + $0x78] sm:$0xff] %v1066_v51  ;;  %v988_v50 = vpop.permute.xlu1 %987  ;;  %1408 = vmatprep.subr.mxu0 %v1066_v51  ;;  %v1954_v51 = vmov 45  }
 0x3c9   :  { %v997_v30 = vsel %vm293_vm8, %v988_v50, %v990_v63  ;;  %v998_v32 = vsel %vm293_vm8, %v994_v14, %v988_v50  ;;  %1409 = vmatpush1.msra.mxu0 %v1065_v28  ;;  %1801 = vset.pattern.permute.xlu1 %v1954_v51 }
 0x3ca   :  { %v1021_v31 = vmul.f32 %v1004_v37, %v998_v32  ;;  %v1022_v44 = vmul.f32 %v1008_v29, %v997_v30  ;;  %v1955_v37 = vmov 44  }
 0x3cb   :  { %1800 = vset.pattern.permute.xlu0 %v1955_v37 }
 0x3cc   :  { %1025 = vst [vmem:[#allocation2 + $0x80] sm:$0xff] %v1021_v31  ;;  %1026 = vst [vmem:[#allocation2 + $0x110] sm:$0xff] %v1022_v44  ;;  %v992_v38 = vpop.permute.xlu1 %991  ;;  %1339 = vmatprep.subr.mxu1 %v1022_v44 }
 0x3cd   :  { %v995_v40 = vsel %vm293_vm8, %v992_v38, %v994_v14  ;;  %v996_v41 = vsel %vm293_vm8, %v990_v63, %v992_v38  ;;  %1340 = vmatpush1.msra.mxu1 %v1021_v31 }
 0x3ce   :  { %v1023_v42 = vmul.f32 %v1012_v33, %v996_v41  ;;  %v1024_v43 = vmul.f32 %v1016_v34, %v995_v40 }
 0x3d0   :  { %1027 = vst [vmem:[#allocation2 + $0x118] sm:$0xff] %v1023_v42  ;;  %1028 = vst [vmem:[#allocation2 + $0x98] sm:$0xff] %v1024_v43  ;;  %v946_v52 = vpop.permute.xlu1 %945  ;;  %1410 = vmatprep.subr.mxu0 %v1024_v43  ;;  %v1956_v43 = vmov 46  }
 0x3d1   :  { %v955_v53 = vsel %vm237_vm7, %v946_v52, %v948_v24  ;;  %v956_v54 = vsel %vm237_vm7, %v952_v36, %v946_v52  ;;  %1411 = vmatpush1.msra.mxu0 %v1023_v42  ;;  %v1864_v42 = vld [vmem:[%s2439_s2] sm:$0xff]  ;;  %s1957_s2 = smov [#allocation8]  }
 0x3d2   :  { %v979_v56 = vmul.f32 %v962_v46, %v956_v54  ;;  %v980_v57 = vmul.f32 %v966_v49, %v955_v53  ;;  %s1704_s8 = sshll.u32 %s1957_s2, 4  ;;  %s1705_s8 = int_to_ptr.vmem [resolvable:$true] %s1704_s8 }
 0x3d3   :  { %s1905_s9 = scalar_lea.vmem %s1705_s8, 512  ;;  %p1910_p11 = scmp.lt.s32.totalorder %s1705_s8, %s1705_s8 }
 0x3d4   :  { %983 = vst [vmem:[#allocation2 + $0x108] sm:$0xff] %v979_v56  ;;  %984 = vst [vmem:[#allocation2 + $0x68] sm:$0xff] %v980_v57  ;;  %v950_v62 = vpop.permute.xlu1 %949  ;;  %1341 = vmatprep.subr.mxu1 %v980_v57  ;;  %p1906_p10 = scmp.ne.s32.totalorder %s1705_s8, %s1905_s9  ;;  %p1911_p12 = scmp.lt.s32.totalorder %s1905_s9, %s1905_s9 }
 0x3d5   :  { %v953_v63 = vsel %vm237_vm7, %v950_v62, %v952_v36  ;;  %v954_v0 = vsel %vm237_vm7, %v948_v24, %v950_v62  ;;  %1342 = vmatpush1.msra.mxu1 %v979_v56 }
 0x3d6   :  { %v981_v47 = vmul.f32 %v970_v59, %v954_v0  ;;  %v982_v58 = vmul.f32 %v974_v60, %v953_v63  ;;  %p1912_p13 = por %p1911_p12, %p1910_p11 }
 0x3d8   :  { %985 = vst [vmem:[#allocation2 + $0x30] sm:$0xff] %v981_v47  ;;  %986 = vst [vmem:[#allocation2 + $0x18] sm:$0xff] %v982_v58  ;;  %v904_v5 = vpop.permute.xlu1 %903  ;;  %1412 = vmatprep.subr.mxu0 %v982_v58  ;;  %p1913_p0 = pnand %p1912_p13, %p1906_p10 }
 0x3d9   :  { %v913_v6 = vsel %vm194_vm9, %v904_v5, %v906_v55  ;;  %v914_v7 = vsel %vm194_vm9, %v910_v4, %v904_v5  ;;  %1413 = vmatpush1.msra.mxu0 %v981_v47 }
 0x3da   :  { %v937_v8 = vmul.f32 %v920_v1, %v914_v7  ;;  %v938_v9 = vmul.f32 %v924_v2, %v913_v6 }
 0x3dc   :  { %941 = vst [vmem:[#allocation2 + $0xb0] sm:$0xff] %v937_v8  ;;  %942 = vst [vmem:[#allocation2 + $0xd0] sm:$0xff] %v938_v9  ;;  %v908_v14 = vpop.permute.xlu1 %907  ;;  %1343 = vmatprep.subr.mxu1 %v938_v9 }
 0x3dd   :  { %v911_v15 = vsel %vm194_vm9, %v908_v14, %v910_v4  ;;  %v912_v16 = vsel %vm194_vm9, %v906_v55, %v908_v14  ;;  %1344 = vmatpush1.msra.mxu1 %v937_v8 }
 0x3de   :  { %v939_v20 = vmul.f32 %v928_v12, %v912_v16  ;;  %v940_v18 = vmul.f32 %v932_v10, %v911_v15  ;;  %1734 = vmatmul.mubr.msk.f32.vlgmr.msra.gmra.mxu1 %vm1309_vm11, %v50_v17  ;;  %1740 = vmatprep.subr.msk.mxu1 %vm644_vm4, %v2045_v13  ;;  %v1863_v13 = vld [vmem:[%s2437_s0 + $0x8] sm:$0xff] }
 0x3df   :  { %1741 = vmatpush1.msk.msra.mxu1 %vm644_vm4, %v1862_v19  ;;  %1612 = vmatprep.mubr.f32.mxu1 %v1945_v45 }
 0x3e0   :  { %943 = vst [vmem:[#allocation2 + $0x10] sm:$0xff] %v939_v20  ;;  %944 = vst [vmem:[#allocation2 + $0x48] sm:$0xff] %v940_v18  ;;  %1414 = vmatprep.subr.mxu0 %v940_v18  ;;  %1743 = vmatprep.subr.msk.mxu1 %vm644_vm4, %v2011_v3 }
 0x3e1   :  { %1415 = vmatpush1.msra.mxu0 %v939_v20 }
 0x3e2   :  { %1735 = vmatmul.mubr.msk.f32.vlgmr.msra.gmra.mxu0 %vm1309_vm11, %v50_v17  ;;  %1742 = vmatmul.mubr.msk.f32.vlgmr.msra.gmra.mxu1 %vm1537_vm12, %v1536_v48 }
 0x3e3   :  { %1744 = vmatpush1.msk.msra.mxu1 %vm644_vm4, %v1863_v13  ;;  %1683 = vmatprep.mubr.f32.mxu1 %v1945_v45 }
 0x3e6   :  { %1745 = vmatmul.mubr.msk.f32.vlgmr.msra.gmra.mxu1 %vm1537_vm12, %v1536_v48 }
 0x3e9   :  { %v1307_v21 = vpop.permute.xlu1 %1306 }
 0x49e   :  { %v1379_v11 = vpop.f32.mrf.mxu1 }
 0x49f   :  { %v1380_v22 = vadd.f32 %v1379_v11, %v1307_v21 }
 0x4a0   :  { %v1381_v23 = vpop.f32.mrf.mxu1 }
 0x4a1   :  { %v1382_v3 = vadd.f32 %v1381_v23, %v1307_v21 }
 0x4a2   :  { %v1450_v25 = vpop.f32.mrf.mxu0  ;;  %v1614_v13 = vpop.f32.mrf.mxu1 }
 0x4a3   :  { %v1455_v26 = vadd.f32 %v1382_v3, %v1380_v22  ;;  %v1451_v39 = vadd.f32 %v1450_v25, %v1307_v21 }
 0x4a4   :  { %v1452_v27 = vpop.f32.mrf.mxu0 }
 0x4a5   :  { %v1453_v24 = vadd.f32 %v1452_v27, %v1307_v21  ;;  %1456 = vadd.xlane.f32.xlu1 %v1455_v26  ;;  %v1616_v21 = vpop.f32.mrf.mxu1 }
 0x4a7   :  { %v1497_v28 = vadd.f32 %v1453_v24, %v1451_v39 }
 0x4a9   :  { %1498 = vadd.xlane.f32.xlu0 %v1497_v28 }
 0x52e   :  { %v1457_v29 = vpop.xlane.xlu1 %1456 }
 0x52f   :  { %v1458_v45 = vmul.f32 0.00390625, %v1457_v29 }
 0x531   :  { %v1459_v50 = vsub.f32 %v1380_v22, %v1458_v45  ;;  %v1460_v30 = vsub.f32 %v1382_v3, %v1458_v45  ;;  %v1685_v3 = vpop.f32.mrf.mxu1 }
 0x532   :  { %v1499_v32 = vpop.xlane.xlu0 %1498 }
 0x533   :  { %v1500_v31 = vmul.f32 0.00390625, %v1499_v32  ;;  %v1461_v44 = vmul.f32 %v1459_v50, %v1459_v50  ;;  %v1462_v33 = vmul.f32 %v1460_v30, %v1460_v30  ;;  %v1687_v29 = vpop.f32.mrf.mxu1 }
 0x535   :  { %v1501_v34 = vsub.f32 %v1451_v39, %v1500_v31  ;;  %v1502_v35 = vsub.f32 %v1453_v24, %v1500_v31  ;;  %v1463_v36 = vadd.f32 %v1462_v33, %v1461_v44 }
 0x537   :  { %1464 = vadd.xlane.f32.xlu0 %v1463_v36  ;;  %v1503_v38 = vmul.f32 %v1501_v34, %v1501_v34  ;;  %v1504_v40 = vmul.f32 %v1502_v35, %v1502_v35 }
 0x539   :  { %v1505_v41 = vadd.f32 %v1504_v40, %v1503_v38 }
 0x53b   :  { %1506 = vadd.xlane.f32.xlu1 %v1505_v41 }
 0x54c   :  { %1478 = vperm.xlu1 %1801, %v1864_v42  }
 0x54d   :  { %1472 = vperm.xlu0 %1800, %v1864_v42  }
 0x550   :  { %1802 = vset.pattern.permute.xlu1 %v1956_v43 }
 0x551   :  { %1532 = vperm.xlu1 %1802, %v1864_v42   ;;  %1803 = vset.pattern.permute.xlu0 %v1956_v43 }
 0x5c0   :  { %v1465_v46 = vpop.xlane.xlu0 %1464 }
 0x5c1   :  { %v1466_v49 = vmul.f32 0.00390625, %v1465_v46 }
 0x5c3   :  { %v1467_v52 = vadd.f32 1e-05, %v1466_v49 }
 0x5c4   :  { %v1507_v53 = vpop.xlane.xlu1 %1506 }
 0x5c5   :  { %1842 = vrsqrt.f32 %v1467_v52  ;;  %v1508_v54 = vmul.f32 0.00390625, %v1507_v53 }
 0x5c7   :  { %v1509_v55 = vadd.f32 1e-05, %v1508_v54 }
 0x5c8   :  { %v1473_v57 = vpop.permute.xlu0 %1472  ;;  %v1479_v0 = vpop.permute.xlu1 %1478 }
 0x5c9   :  { %1844 = vrsqrt.f32 %v1509_v55 }
 0x5cc   :  { %v1533_v11 = vpop.permute.xlu1 %1532 }
 0x5cd   :  { %v1615_v25 = vadd.f32 %v1614_v13, %v1533_v11  ;;  %v1617_v27 = vadd.f32 %v1616_v21, %v1533_v11  ;;  %v1686_v45 = vadd.f32 %v1685_v3, %v1533_v11 }
 0x5d2   :  { %v1843_v56 = vpop.eup %1842 }
 0x5d3   :  { %v1469_v59 = vmul.f32 %v1843_v56, %v1459_v50  ;;  %v1470_v60 = vmul.f32 %v1843_v56, %v1460_v30  ;;  %v1688_v30 = vadd.f32 %v1687_v29, %v1533_v11 }
 0x5d5   :  { %v1475_v61 = vmul.f32 %v1473_v57, %v1469_v59  ;;  %v1476_v62 = vmul.f32 %v1473_v57, %v1470_v60 }
 0x5d6   :  { %v1845_v63 = vpop.eup %1844 }
 0x5d7   :  { %v1481_v47 = vadd.f32 %v1479_v0, %v1475_v61  ;;  %v1482_v58 = vadd.f32 %v1479_v0, %v1476_v62  ;;  %v1511_v1 = vmul.f32 %v1845_v63, %v1501_v34  ;;  %v1512_v2 = vmul.f32 %v1845_v63, %v1502_v35 }
 0x5d9   :  { %v1736_v4 = vmul.f32 -1.442695, %v1481_v47  ;;  %v1737_v5 = vmul.f32 -1.442695, %v1482_v58  ;;  %v1513_v6 = vmul.f32 %v1511_v1, %v1473_v57  ;;  %v1514_v7 = vmul.f32 %v1512_v2, %v1473_v57 }
 0x5db   :  { %1846 = vpow2.f32 %v1736_v4  ;;  %v1515_v8 = vadd.f32 %v1513_v6, %v1479_v0  ;;  %v1516_v9 = vadd.f32 %v1514_v7, %v1479_v0 }
 0x5dc   :  { %1848 = vpow2.f32 %v1737_v5 }
 0x5dd   :  { %v1738_v12 = vmul.f32 -1.442695, %v1515_v8  ;;  %v1739_v10 = vmul.f32 -1.442695, %v1516_v9 }
 0x5df   :  { %1850 = vpow2.f32 %v1738_v12 }
 0x5e0   :  { %1852 = vpow2.f32 %v1739_v10 }
 0x5e8   :  { %v1847_v17 = vpop.eup %1846 }
 0x5e9   :  { %v1849_v14 = vpop.eup %1848  ;;  %v1489_v15 = vadd.f32 1.0, %v1847_v17 }
 0x5ea   :  { %v1490_v16 = vadd.f32 1.0, %v1849_v14 }
 0x5eb   :  { %1854 = vrcp.f32 %v1489_v15 }
 0x5ec   :  { %v1851_v20 = vpop.eup %1850  ;;  %1856 = vrcp.f32 %v1490_v16 }
 0x5ed   :  { %v1853_v18 = vpop.eup %1852  ;;  %v1523_v19 = vadd.f32 1.0, %v1851_v20 }
 0x5ee   :  { %v1524_v48 = vadd.f32 1.0, %v1853_v18 }
 0x5ef   :  { %1858 = vrcp.f32 %v1523_v19 }
 0x5f0   :  { %1860 = vrcp.f32 %v1524_v48 }
 0x5f8   :  { %v1855_v22 = vpop.eup %1854 }
 0x5f9   :  { %v1857_v23 = vpop.eup %1856  ;;  %v1495_v26 = vmul.f32 %v1855_v22, %v1481_v47 }
 0x5fa   :  { %v1496_v39 = vmul.f32 %v1857_v23, %v1482_v58 }
 0x5fb   :  { %v1690_v24 = vadd.f32 %v1615_v25, %v1495_v26 }
 0x5fc   :  { %v1859_v28 = vpop.eup %1858  ;;  %v1691_v51 = vadd.f32 %v1617_v27, %v1496_v39 }
 0x5fd   :  { %v1861_v37 = vpop.eup %1860  ;;  %v1529_v50 = vmul.f32 %v1859_v28, %v1515_v8  ;;  %1694 = vst [vmem:[#allocation8] sm:$0xff] %v1690_v24 }
 0x5fe   :  { %v1530_v32 = vmul.f32 %v1861_v37, %v1516_v9  ;;  %1695 = vst [vmem:[#allocation8 + $0x8] sm:$0xff] %v1691_v51 }
 0x5ff   :  { %v1692_v31 = vadd.f32 %v1686_v45, %v1529_v50 }
 0x600   :  { %v1693_v44 = vadd.f32 %v1688_v30, %v1530_v32 }
 0x601   :  { %1697 = vst [vmem:[#allocation8 + $0x10] sm:$0xff] %v1692_v31 }
 0x602   :  { %1698 = vst [vmem:[#allocation8 + $0x18] sm:$0xff] %v1693_v44 }
 0x603   :  { %1916 = shalt.err (!%p1913_p0)
}
 0x604   :  { %s1958_s10 = smov 256  }
 0x605   :  { %1710 = dma.vmem_to_hbm [thread:$0]  %s1705_s8, 512, %s2442_s5, [#allocation5], %s1958_s10, %s1958_s10, %s1942_s21  }
 0x606   :  { %1929 = dma.done.wait [#allocation5], 512  }
 0x607   :  { %1930 = vsyncadd [#allocation5], 4294966784 }
 0x608   :  { %1714 = vsyncpa [#allocation4], 1 }
 0x609   :  { %1715 = vsyncpa [#allocation7], 1 }
 0x60a   :  { %1716 = vsyncpa [#allocation5], 1 }

</bundles_post_ra>
